<compile_context>
chip_gen: v5e
topology: v5e:2x2
jax: 0.10.0
libtpu: 0.0.40
codegen_flags: <defaults>
</compile_context>

<pallas_src>
import math

import jax
import jax.numpy as jnp
from jax.experimental import pallas as pl
from jax.experimental.pallas import tpu as pltpu

# ---- small config, structurally identical to kobert-base (scaled from 768/12/12) ----
VOCAB = 100
VOCAB_PAD = 128            # word-emb table zero-padded -> aligned one-hot matmul
MAX_POS = 64
TYPE_VOCAB = 2
HIDDEN = 128
NUM_HEADS = 2
HEAD_DIM = HIDDEN // NUM_HEADS
INTERMEDIATE = 256
NUM_LAYERS = 2
NUM_SUBJECTS = 20          # matches module default
NUM_HEAD_OUT = 1 + 2 + NUM_SUBJECTS      # score(1) + awkward(2) + subject(20) = 23
HEAD_OUT_PAD = 128         # lane-dense output store; host slices first 23 columns
B_PAD = 8                  # sublane-padded CLS-row count for the pooled/head slab
LN_EPS = 1e-12             # BERT LayerNorm eps
NEG_INF = -1e9             # additive attention-mask fill

# Matmul operand dtype (accumulation is always f32 via preferred_element_type).
# bfloat16 -> MXU fast path + half weight DMA; set float32 for bit-closer parity
# with the f32 PyTorch reference.
MM_DTYPE = jnp.bfloat16


# ---------------------------------------------------------------------------
# in-kernel helpers
# ---------------------------------------------------------------------------
def _layernorm(x, g, b, eps=LN_EPS):
    mu = jnp.mean(x, axis=-1, keepdims=True)
    var = jnp.mean(jnp.square(x - mu), axis=-1, keepdims=True)
    return (x - mu) * jax.lax.rsqrt(var + eps) * g + b


def _gelu_tanh(x):
    # TODO(synk): HF BERT uses exact erf-GELU; tanh approx deviates ~1e-3.
    c = math.sqrt(2.0 / math.pi)
    return 0.5 * x * (1.0 + jnp.tanh(c * (x + 0.044715 * x * x * x)))


def _mm(a, b):
    # bf16 (or f32) operands, f32 accumulation on the MXU.
    return jnp.dot(a.astype(MM_DTYPE), b.astype(MM_DTYPE),
                   preferred_element_type=jnp.float32)


# ---------------------------------------------------------------------------
# fused Pallas kernel, grid=(NUM_LAYERS,):
#   l==0: embeddings -> every l: encoder layer l -> l==last: pooler + heads
# ---------------------------------------------------------------------------
def kobert_fused_kernel(
        hot_ref, pos_type_ref, mask_ref, hmask_ref, cls_sel_ref,
        word_emb_ref, emb_g_ref, emb_b_ref,
        wqkv_ref, bqkv_ref, wo_ref, bo_ref, g1_ref, b1_ref,
        wi_ref, bi_ref, wf_ref, bf_ref, g2_ref, b2_ref,
        pool_w_ref, pool_b_ref, heads_w_ref, heads_b_ref,
        out_ref, x_ref):
    l = pl.program_id(0)
    last = pl.num_programs(0) - 1

    # ---- embeddings (first grid step only): one-hot @ table + pos/type + LN ----
    @pl.when(l == 0)
    def _():
        e = jnp.dot(hot_ref[...], word_emb_ref[...],
                    preferred_element_type=jnp.float32)          # (R, H) f32
        e = e + pos_type_ref[...]                                # position + token-type(0)
        x_ref[...] = _layernorm(e, emb_g_ref[...], emb_b_ref[...])

    x = x_ref[...]                                               # (R, H) f32, carried
    mask = mask_ref[...]                                         # (R, R) additive mask

    # ---- encoder layer l (per-layer weights delivered by BlockSpec) ----
    # fused QKV projection; 1/sqrt(HEAD_DIM) is pre-folded into Wq/bq.
    qkv = _mm(x, wqkv_ref[...]) + bqkv_ref[...]                  # (R, 3H) f32
    q = qkv[:, 0:HIDDEN].astype(MM_DTYPE)                        # 128-lane aligned slices
    k = qkv[:, HIDDEN:2 * HIDDEN].astype(MM_DTYPE)
    v = qkv[:, 2 * HIDDEN:3 * HIDDEN].astype(MM_DTYPE)

    # masked full-width multi-head attention: no 64-lane slices, no concat.
    # s_h[i,j] = sum_d (q*mask_h)[i,d] * k[j,d] -> exact per-head scores;
    # ctx = sum_h p_h @ (v*mask_h) reproduces the concatenated per-head contexts.
    ctx = jnp.zeros(x.shape, jnp.float32)
    for h in range(NUM_HEADS):
        hm = hmask_ref[h:h + 1, :]                               # (1, H) {0,1}
        s = jax.lax.dot_general(q * hm, k, (((1,), (1,)), ((), ())),
                                preferred_element_type=jnp.float32)   # (R, R)
        p = jax.nn.softmax(s + mask, axis=-1).astype(MM_DTYPE)         # f32 softmax
        ctx = ctx + jnp.dot(p, v * hm, preferred_element_type=jnp.float32)

    # output projection + residual + LayerNorm
    attn = _mm(ctx, wo_ref[...]) + bo_ref[...]
    x = _layernorm(x + attn, g1_ref[...], b1_ref[...])

    # FFN (GELU) + residual + LayerNorm
    ff = _gelu_tanh(_mm(x, wi_ref[...]) + bi_ref[...])
    ff = _mm(ff, wf_ref[...]) + bf_ref[...]
    x = _layernorm(x + ff, g2_ref[...], b2_ref[...])
    x_ref[...] = x

    # ---- pooler + fused heads on CLS rows only (last grid step) ----
    @pl.when(l == last)
    def _():
        cls = jnp.dot(cls_sel_ref[...], x.astype(MM_DTYPE),
                      preferred_element_type=jnp.float32)        # (B_PAD, H)
        pooled = jnp.tanh(_mm(cls, pool_w_ref[...]) + pool_b_ref[...])
        out_ref[...] = (_mm(pooled, heads_w_ref[...]) + heads_b_ref[...]
                        ).astype(out_ref.dtype)                  # (B_PAD, 128)


# ---------------------------------------------------------------------------
# wrapper: plain-JAX glue (one-hot ids / masks / selectors) + one pallas_call
# ---------------------------------------------------------------------------
def kobert_extended_forward(params, input_ids, attention_mask):
    B, S = input_ids.shape
    R = B * S

    # lane-dense one-hot ids (exact in bf16), computed once outside the kernel
    ids = input_ids.reshape(R, 1).astype(jnp.int32)
    hot = (ids == jnp.arange(VOCAB_PAD, dtype=jnp.int32)[None, :]).astype(MM_DTYPE)

    # Additive mask: 0 where (same batch AND key not padded), NEG_INF elsewhere.
    # TODO(synk): switch to a parallel per-batch grid axis with (S,S) masks when
    # B*S grows (uses both v7x TensorCores, keeps attention memory linear in S).
    batch_ids = jnp.repeat(jnp.arange(B, dtype=jnp.int32), S)            # (R,)
    same_batch = batch_ids[:, None] == batch_ids[None, :]                # (R, R)
    key_ok = attention_mask.reshape(-1).astype(bool)[None, :]            # (1, R)
    mask2d = jnp.where(same_batch & key_ok, 0.0, NEG_INF).astype(jnp.float32)

    # Position + token-type(=0) embedding slab (input-independent, tiny).
    pos_type = (jnp.tile(params["pos_emb"][:S], (B, 1))
                + params["type_emb"][0:1]).astype(jnp.float32)           # (R, H)

    # per-head lane masks (NUM_HEADS, H): 1 on the head's 64 lanes, 0 elsewhere
    lane = jnp.arange(HIDDEN, dtype=jnp.int32)[None, :]
    hmask = ((lane // HEAD_DIM) ==
             jnp.arange(NUM_HEADS, dtype=jnp.int32)[:, None]).astype(MM_DTYPE)

    # CLS-row (token 0 of each batch) one-hot selector, sublane-padded to 8 rows
    rows = jnp.arange(B_PAD, dtype=jnp.int32)[:, None]
    cols = jnp.arange(R, dtype=jnp.int32)[None, :]
    cls_sel = ((rows < B) & (cols == rows * S)).astype(MM_DTYPE)         # (8, R)

    const_args = (hot, pos_type, mask2d, hmask, cls_sel,
                  params["word_emb_pad"], params["emb_g"], params["emb_b"])
    layer_args = (params["wqkv"], params["bqkv"], params["wo"], params["bo"],
                  params["g1"], params["b1"],
                  params["wi"], params["bi"], params["wf"], params["bf"],
                  params["g2"], params["b2"])
    tail_args = (params["pool_w"], params["pool_b"],
                 params["heads_w"], params["heads_b"])

    def const_spec(a):
        n = a.ndim
        return pl.BlockSpec(a.shape, lambda l: (0,) * n)

    def layer_spec(a):
        n = a.ndim
        return pl.BlockSpec((None,) + a.shape[1:], lambda l: (l,) + (0,) * (n - 1))

    in_specs = ([const_spec(a) for a in const_args]
                + [layer_spec(a) for a in layer_args]
                + [const_spec(a) for a in tail_args])

    out = pl.pallas_call(
        kobert_fused_kernel,
        out_shape=jax.ShapeDtypeStruct((B_PAD, HEAD_OUT_PAD), jnp.float32),
        grid=(NUM_LAYERS,),
        in_specs=in_specs,
        out_specs=pl.BlockSpec((B_PAD, HEAD_OUT_PAD), lambda l: (0, 0)),
        scratch_shapes=[pltpu.VMEM((R, HIDDEN), jnp.float32)],   # carried activation
        compiler_params=pltpu.CompilerParams(dimension_semantics=("arbitrary",)),
    )(*const_args, *layer_args, *tail_args)

    logits = out[:B]                                   # drop sublane padding rows
    score = logits[:, 0:1]
    awkward = logits[:, 1:3]
    subject = logits[:, 3:3 + NUM_SUBJECTS]
    return score, awkward, subject


# ---------------------------------------------------------------------------
# parameters (packed/fused layout; BertModel.from_pretrained -> random init here)
# ---------------------------------------------------------------------------
def init_params(key):
    def dense(k, fan_in, fan_out):
        kw, kb = jax.random.split(k)
        w = (0.02 * jax.random.normal(kw, (fan_in, fan_out))).astype(jnp.float32)
        b = (0.02 * jax.random.normal(kb, (1, fan_out))).astype(jnp.float32)
        return w, b

    keys = jax.random.split(key, 8 + NUM_LAYERS)
    word_emb = (0.02 * jax.random.normal(keys[0], (VOCAB, HIDDEN))).astype(jnp.float32)
    params = {
        # zero-padded to VOCAB_PAD rows, stored bf16 so the one-hot matmul is bf16xbf16
        "word_emb_pad": (jnp.zeros((VOCAB_PAD, HIDDEN), jnp.float32)
                         .at[:VOCAB].set(word_emb)).astype(MM_DTYPE),
        "pos_emb": (0.02 * jax.random.normal(keys[1], (MAX_POS, HIDDEN))).astype(jnp.float32),
        "type_emb": (0.02 * jax.random.normal(keys[2], (TYPE_VOCAB, HIDDEN))).astype(jnp.float32),
        "emb_g": jnp.ones((1, HIDDEN), jnp.float32),
        "emb_b": jnp.zeros((1, HIDDEN), jnp.float32),
    }

    scale = 1.0 / math.sqrt(HEAD_DIM)
    wqkv, bqkv, wo, bo, wi, bi, wf, bf = [], [], [], [], [], [], [], []
    for l in range(NUM_LAYERS):
        lk = jax.random.split(keys[3 + l], 6)
        wq, bq = dense(lk[0], HIDDEN, HIDDEN)
        wk, bk = dense(lk[1], HIDDEN, HIDDEN)
        wv, bv = dense(lk[2], HIDDEN, HIDDEN)
        w_o, b_o = dense(lk[3], HIDDEN, HIDDEN)
        w_i, b_i = dense(lk[4], HIDDEN, INTERMEDIATE)
        w_f, b_f = dense(lk[5], INTERMEDIATE, HIDDEN)
        # fold the 1/sqrt(HEAD_DIM) attention scale into Wq / bq (exact rewrite)
        wqkv.append(jnp.concatenate([wq * scale, wk, wv], axis=1))      # (H, 3H)
        bqkv.append(jnp.concatenate([bq * scale, bk, bv], axis=1))      # (1, 3H)
        wo.append(w_o); bo.append(b_o)
        wi.append(w_i); bi.append(b_i)
        wf.append(w_f); bf.append(b_f)

    stack_w = lambda lst: jnp.stack(lst, axis=0).astype(MM_DTYPE)   # matmul weights
    stack_b = lambda lst: jnp.stack(lst, axis=0)                    # biases stay f32

    params.update(
        wqkv=stack_w(wqkv), bqkv=stack_b(bqkv),
        wo=stack_w(wo), bo=stack_b(bo),
        wi=stack_w(wi), bi=stack_b(bi),
        wf=stack_w(wf), bf=stack_b(bf),
        g1=jnp.ones((NUM_LAYERS, 1, HIDDEN), jnp.float32),
        b1=jnp.zeros((NUM_LAYERS, 1, HIDDEN), jnp.float32),
        g2=jnp.ones((NUM_LAYERS, 1, HIDDEN), jnp.float32),
        b2=jnp.zeros((NUM_LAYERS, 1, HIDDEN), jnp.float32),
    )

    kp = 3 + NUM_LAYERS
    pool_w, pool_b = dense(keys[kp], HIDDEN, HIDDEN)
    ws, bs = dense(keys[kp + 1], HIDDEN, 1)                  # score_head
    wa, ba = dense(keys[kp + 2], HIDDEN, 2)                  # awkward_head
    wsub, bsub = dense(keys[kp + 3], HIDDEN, NUM_SUBJECTS)   # subject_head
    heads_w = jnp.concatenate([ws, wa, wsub], axis=1)        # (H, 23)
    heads_b = jnp.concatenate([bs, ba, bsub], axis=1)        # (1, 23)
    params["pool_w"] = pool_w.astype(MM_DTYPE)
    params["pool_b"] = pool_b
    # zero-pad fused heads to 128 output lanes -> lane-dense unmasked stores
    params["heads_w"] = (jnp.zeros((HIDDEN, HEAD_OUT_PAD), MM_DTYPE)
                         .at[:, :NUM_HEAD_OUT].set(heads_w.astype(MM_DTYPE)))
    params["heads_b"] = (jnp.zeros((1, HEAD_OUT_PAD), jnp.float32)
                         .at[:, :NUM_HEAD_OUT].set(heads_b))
    return params


if __name__ == "__main__":
    key = jax.random.PRNGKey(0)
    pkey, ikey = jax.random.split(key)
    params = init_params(pkey)

    B, S = 2, 16
    input_ids = jax.random.randint(ikey, (B, S), 0, VOCAB, dtype=jnp.int32)
    attention_mask = jnp.array([[1] * S, [1] * (S - 4) + [0] * 4], dtype=jnp.int32)

    fwd = jax.jit(kobert_extended_forward)
    score, awkward, subject = fwd(params, input_ids, attention_mask)
    jax.block_until_ready((score, awkward, subject))

    assert score.shape == (B, 1)
    assert awkward.shape == (B, 2)
    assert subject.shape == (B, NUM_SUBJECTS)
    print("KERNEL_OK")
</pallas_src>

<mosaic_0001>
module attributes {stable_mosaic.version = 11 : i64} {
  func.func @kobert_fused_kernel(%arg0: i32, %arg1: memref<32x128xbf16, #tpu.memory_space<vmem>>, %arg2: memref<32x128xf32, #tpu.memory_space<vmem>>, %arg3: memref<32x32xf32, #tpu.memory_space<vmem>>, %arg4: memref<2x128xbf16, #tpu.memory_space<vmem>>, %arg5: memref<8x32xbf16, #tpu.memory_space<vmem>>, %arg6: memref<128x128xbf16, #tpu.memory_space<vmem>>, %arg7: memref<1x128xf32, #tpu.memory_space<vmem>>, %arg8: memref<1x128xf32, #tpu.memory_space<vmem>>, %arg9: memref<1x128x384xbf16, #tpu.memory_space<vmem>>, %arg10: memref<1x1x384xf32, #tpu.memory_space<vmem>>, %arg11: memref<1x128x128xbf16, #tpu.memory_space<vmem>>, %arg12: memref<1x1x128xf32, #tpu.memory_space<vmem>>, %arg13: memref<1x1x128xf32, #tpu.memory_space<vmem>>, %arg14: memref<1x1x128xf32, #tpu.memory_space<vmem>>, %arg15: memref<1x128x256xbf16, #tpu.memory_space<vmem>>, %arg16: memref<1x1x256xf32, #tpu.memory_space<vmem>>, %arg17: memref<1x256x128xbf16, #tpu.memory_space<vmem>>, %arg18: memref<1x1x128xf32, #tpu.memory_space<vmem>>, %arg19: memref<1x1x128xf32, #tpu.memory_space<vmem>>, %arg20: memref<1x1x128xf32, #tpu.memory_space<vmem>>, %arg21: memref<128x128xbf16, #tpu.memory_space<vmem>>, %arg22: memref<1x128xf32, #tpu.memory_space<vmem>>, %arg23: memref<128x128xbf16, #tpu.memory_space<vmem>>, %arg24: memref<1x128xf32, #tpu.memory_space<vmem>>, %arg25: memref<8x128xf32, #tpu.memory_space<vmem>>, %arg26: memref<32x128xf32, #tpu.memory_space<vmem>>) attributes {dimension_semantics = [#tpu.dimension_semantics<arbitrary>], iteration_bounds = array<i64: 2>, scalar_prefetch = 0 : i64, scratch_operands = 1 : i64, tpu.core_type = #tpu.core_type<tc>, window_params = [{pipeline_mode = #tpu.pipeline_mode<synchronous>, transform_indices = @transform_0, window_bounds = array<i64: 32, 128>}, {pipeline_mode = #tpu.pipeline_mode<synchronous>, transform_indices = @transform_1, window_bounds = array<i64: 32, 128>}, {pipeline_mode = #tpu.pipeline_mode<synchronous>, transform_indices = @transform_2, window_bounds = array<i64: 32, 32>}, {pipeline_mode = #tpu.pipeline_mode<synchronous>, transform_indices = @transform_3, window_bounds = array<i64: 2, 128>}, {pipeline_mode = #tpu.pipeline_mode<synchronous>, transform_indices = @transform_4, window_bounds = array<i64: 8, 32>}, {pipeline_mode = #tpu.pipeline_mode<synchronous>, transform_indices = @transform_5, window_bounds = array<i64: 128, 128>}, {pipeline_mode = #tpu.pipeline_mode<synchronous>, transform_indices = @transform_6, window_bounds = array<i64: 1, 128>}, {pipeline_mode = #tpu.pipeline_mode<synchronous>, transform_indices = @transform_7, window_bounds = array<i64: 1, 128>}, {transform_indices = @transform_8, window_bounds = array<i64: 1, 128, 384>}, {transform_indices = @transform_9, window_bounds = array<i64: 1, 1, 384>}, {transform_indices = @transform_10, window_bounds = array<i64: 1, 128, 128>}, {transform_indices = @transform_11, window_bounds = array<i64: 1, 1, 128>}, {transform_indices = @transform_12, window_bounds = array<i64: 1, 1, 128>}, {transform_indices = @transform_13, window_bounds = array<i64: 1, 1, 128>}, {transform_indices = @transform_14, window_bounds = array<i64: 1, 128, 256>}, {transform_indices = @transform_15, window_bounds = array<i64: 1, 1, 256>}, {transform_indices = @transform_16, window_bounds = array<i64: 1, 256, 128>}, {transform_indices = @transform_17, window_bounds = array<i64: 1, 1, 128>}, {transform_indices = @transform_18, window_bounds = array<i64: 1, 1, 128>}, {transform_indices = @transform_19, window_bounds = array<i64: 1, 1, 128>}, {pipeline_mode = #tpu.pipeline_mode<synchronous>, transform_indices = @transform_20, window_bounds = array<i64: 128, 128>}, {pipeline_mode = #tpu.pipeline_mode<synchronous>, transform_indices = @transform_21, window_bounds = array<i64: 1, 128>}, {pipeline_mode = #tpu.pipeline_mode<synchronous>, transform_indices = @transform_22, window_bounds = array<i64: 128, 128>}, {pipeline_mode = #tpu.pipeline_mode<synchronous>, transform_indices = @transform_23, window_bounds = array<i64: 1, 128>}, {pipeline_mode = #tpu.pipeline_mode<synchronous>, transform_indices = @transform_24, window_bounds = array<i64: 8, 128>}]} {
    %c0_i32 = arith.constant 0 : i32
    %0 = arith.cmpi eq, %arg0, %c0_i32 : i32
    %1 = arith.extui %0 : i1 to i32
    %c0_i32_0 = arith.constant 0 : i32
    %2 = arith.cmpi ne, %1, %c0_i32_0 : i32
    scf.if %2 {
      %c0_74 = arith.constant 0 : index
      %c0_75 = arith.constant 0 : index
      %157 = vector.load %arg1[%c0_74, %c0_75] : memref<32x128xbf16, #tpu.memory_space<vmem>>, vector<32x128xbf16>
      %c0_76 = arith.constant 0 : index
      %c0_77 = arith.constant 0 : index
      %158 = vector.load %arg6[%c0_76, %c0_77] : memref<128x128xbf16, #tpu.memory_space<vmem>>, vector<128x128xbf16>
      %cst_78 = arith.constant dense<0.000000e+00> : vector<32x128xf32>
      %159 = tpu.matmul %157, %158, %cst_78 {dimension_numbers = #tpu.dot_dimension_numbers<[1], [0], [0], [1], [0, 0, 1, 1], [], []>} : vector<32x128xbf16>, vector<128x128xbf16>, vector<32x128xf32> -> vector<32x128xf32>
      %c0_79 = arith.constant 0 : index
      %c0_80 = arith.constant 0 : index
      %160 = vector.load %arg2[%c0_79, %c0_80] : memref<32x128xf32, #tpu.memory_space<vmem>>, vector<32x128xf32>
      %161 = arith.addf %159, %160 : vector<32x128xf32>
      %c0_81 = arith.constant 0 : index
      %c0_82 = arith.constant 0 : index
      %162 = vector.load %arg7[%c0_81, %c0_82] : memref<1x128xf32, #tpu.memory_space<vmem>>, vector<1x128xf32>
      %c0_83 = arith.constant 0 : index
      %c0_84 = arith.constant 0 : index
      %163 = vector.load %arg8[%c0_83, %c0_84] : memref<1x128xf32, #tpu.memory_space<vmem>>, vector<1x128xf32>
      %cst_85 = arith.constant dense<0.000000e+00> : vector<32xf32>
      %164 = vector.multi_reduction <add>, %161, %cst_85 [1] : vector<32x128xf32> to vector<32xf32>
      %165 = vector.shape_cast %164 : vector<32xf32> to vector<32x1xf32>
      %cst_86 = arith.constant 1.280000e+02 : f32
      %166 = vector.broadcast %cst_86 : f32 to vector<32x1xf32>
      %167 = arith.divf %165, %166 : vector<32x1xf32>
      %168 = vector.broadcast %167 : vector<32x1xf32> to vector<32x128xf32>
      %169 = arith.subf %161, %168 : vector<32x128xf32>
      %170 = arith.mulf %169, %169 : vector<32x128xf32>
      %cst_87 = arith.constant dense<0.000000e+00> : vector<32xf32>
      %171 = vector.multi_reduction <add>, %170, %cst_87 [1] : vector<32x128xf32> to vector<32xf32>
      %172 = vector.shape_cast %171 : vector<32xf32> to vector<32x1xf32>
      %cst_88 = arith.constant 1.280000e+02 : f32
      %173 = vector.broadcast %cst_88 : f32 to vector<32x1xf32>
      %174 = arith.divf %172, %173 : vector<32x1xf32>
      %175 = vector.broadcast %167 : vector<32x1xf32> to vector<32x128xf32>
      %176 = arith.subf %161, %175 : vector<32x128xf32>
      %cst_89 = arith.constant 9.99999996E-13 : f32
      %177 = vector.broadcast %cst_89 : f32 to vector<32x1xf32>
      %178 = arith.addf %174, %177 : vector<32x1xf32>
      %179 = math.rsqrt %178 : vector<32x1xf32>
      %180 = vector.broadcast %179 : vector<32x1xf32> to vector<32x128xf32>
      %181 = arith.mulf %176, %180 : vector<32x128xf32>
      %182 = vector.broadcast %162 : vector<1x128xf32> to vector<32x128xf32>
      %183 = arith.mulf %181, %182 : vector<32x128xf32>
      %184 = vector.broadcast %163 : vector<1x128xf32> to vector<32x128xf32>
      %185 = arith.addf %183, %184 : vector<32x128xf32>
      %c0_90 = arith.constant 0 : index
      %c0_91 = arith.constant 0 : index
      %186 = vector.load %arg26[%c0_90, %c0_91] : memref<32x128xf32, #tpu.memory_space<vmem>>, vector<32x128xf32>
      tpu.vector_store %arg26[%c0_90, %c0_91], %185 {strides = array<i32>} : memref<32x128xf32, #tpu.memory_space<vmem>>, vector<32x128xf32>,
    } else {
    }
    %c0 = arith.constant 0 : index
    %c0_1 = arith.constant 0 : index
    %3 = vector.load %arg26[%c0, %c0_1] : memref<32x128xf32, #tpu.memory_space<vmem>>, vector<32x128xf32>
    %c0_2 = arith.constant 0 : index
    %c0_3 = arith.constant 0 : index
    %4 = vector.load %arg3[%c0_2, %c0_3] : memref<32x32xf32, #tpu.memory_space<vmem>>, vector<32x32xf32>
    %c0_4 = arith.constant 0 : index
    %c0_5 = arith.constant 0 : index
    %c0_6 = arith.constant 0 : index
    %5 = vector.load %arg9[%c0_4, %c0_5, %c0_6] : memref<1x128x384xbf16, #tpu.memory_space<vmem>>, vector<1x128x384xbf16>
    %6 = vector.shape_cast %5 : vector<1x128x384xbf16> to vector<128x384xbf16>
    %7 = arith.truncf %3 : vector<32x128xf32> to vector<32x128xbf16>
    %cst = arith.constant dense<0.000000e+00> : vector<32x384xf32>
    %8 = tpu.matmul %7, %6, %cst {dimension_numbers = #tpu.dot_dimension_numbers<[1], [0], [0], [1], [0, 0, 1, 1], [], []>} : vector<32x128xbf16>, vector<128x384xbf16>, vector<32x384xf32> -> vector<32x384xf32>
    %c0_7 = arith.constant 0 : index
    %c0_8 = arith.constant 0 : index
    %c0_9 = arith.constant 0 : index
    %9 = vector.load %arg10[%c0_7, %c0_8, %c0_9] : memref<1x1x384xf32, #tpu.memory_space<vmem>>, vector<1x1x384xf32>
    %10 = vector.shape_cast %9 : vector<1x1x384xf32> to vector<1x384xf32>
    %11 = vector.broadcast %10 : vector<1x384xf32> to vector<32x384xf32>
    %12 = arith.addf %8, %11 : vector<32x384xf32>
    %13 = vector.extract_strided_slice %12 {offsets = [0, 0], sizes = [32, 128], strides = [1, 1]} : vector<32x384xf32> to vector<32x128xf32>
    %14 = arith.truncf %13 : vector<32x128xf32> to vector<32x128xbf16>
    %15 = vector.extract_strided_slice %12 {offsets = [0, 128], sizes = [32, 128], strides = [1, 1]} : vector<32x384xf32> to vector<32x128xf32>
    %16 = arith.truncf %15 : vector<32x128xf32> to vector<32x128xbf16>
    %17 = vector.extract_strided_slice %12 {offsets = [0, 256], sizes = [32, 128], strides = [1, 1]} : vector<32x384xf32> to vector<32x128xf32>
    %18 = arith.truncf %17 : vector<32x128xf32> to vector<32x128xbf16>
    %cst_10 = arith.constant 0.000000e+00 : f32
    %19 = vector.broadcast %cst_10 : f32 to vector<32x128xf32>
    %c0_11 = arith.constant 0 : index
    %c0_12 = arith.constant 0 : index
    %20 = vector.load %arg4[%c0_11, %c0_12] : memref<2x128xbf16, #tpu.memory_space<vmem>>, vector<1x128xbf16>
    %21 = vector.broadcast %20 : vector<1x128xbf16> to vector<32x128xbf16>
    %22 = arith.mulf %14, %21 : vector<32x128xbf16>
    %cst_13 = arith.constant dense<0.000000e+00> : vector<32x32xf32>
    %23 = tpu.matmul %22, %16, %cst_13 {dimension_numbers = #tpu.dot_dimension_numbers<[1], [1], [0], [0], [0, 0, 1, 0], [], []>} : vector<32x128xbf16>, vector<32x128xbf16>, vector<32x32xf32> -> vector<32x32xf32>
    %24 = arith.addf %23, %4 : vector<32x32xf32>
    %cst_14 = arith.constant dense<0xFF800000> : vector<32xf32>
    %25 = vector.multi_reduction <maximumf>, %24, %cst_14 [1] : vector<32x32xf32> to vector<32xf32>
    %cst_15 = arith.constant 0xFF800000 : f32
    %26 = vector.broadcast %cst_15 : f32 to vector<32xf32>
    %27 = arith.maximumf %26, %25 : vector<32xf32>
    %28 = vector.shape_cast %27 : vector<32xf32> to vector<32x1xf32>
    %29 = vector.broadcast %28 : vector<32x1xf32> to vector<32x32xf32>
    %30 = arith.subf %24, %29 : vector<32x32xf32>
    %31 = math.exp %30 : vector<32x32xf32>
    %cst_16 = arith.constant dense<0.000000e+00> : vector<32xf32>
    %32 = vector.multi_reduction <add>, %31, %cst_16 [1] : vector<32x32xf32> to vector<32xf32>
    %33 = vector.shape_cast %32 : vector<32xf32> to vector<32x1xf32>
    %34 = vector.broadcast %33 : vector<32x1xf32> to vector<32x32xf32>
    %35 = arith.divf %31, %34 : vector<32x32xf32>
    %36 = arith.truncf %35 : vector<32x32xf32> to vector<32x32xbf16>
    %37 = vector.broadcast %20 : vector<1x128xbf16> to vector<32x128xbf16>
    %38 = arith.mulf %18, %37 : vector<32x128xbf16>
    %cst_17 = arith.constant dense<0.000000e+00> : vector<32x128xf32>
    %39 = tpu.matmul %36, %38, %cst_17 {dimension_numbers = #tpu.dot_dimension_numbers<[1], [0], [0], [1], [0, 0, 1, 1], [], []>} : vector<32x32xbf16>, vector<32x128xbf16>, vector<32x128xf32> -> vector<32x128xf32>
    %40 = arith.addf %19, %39 : vector<32x128xf32>
    %c1 = arith.constant 1 : index
    %c0_18 = arith.constant 0 : index
    %41 = vector.load %arg4[%c1, %c0_18] : memref<2x128xbf16, #tpu.memory_space<vmem>>, vector<1x128xbf16>
    %42 = vector.broadcast %41 : vector<1x128xbf16> to vector<32x128xbf16>
    %43 = arith.mulf %14, %42 : vector<32x128xbf16>
    %cst_19 = arith.constant dense<0.000000e+00> : vector<32x32xf32>
    %44 = tpu.matmul %43, %16, %cst_19 {dimension_numbers = #tpu.dot_dimension_numbers<[1], [1], [0], [0], [0, 0, 1, 0], [], []>} : vector<32x128xbf16>, vector<32x128xbf16>, vector<32x32xf32> -> vector<32x32xf32>
    %45 = arith.addf %44, %4 : vector<32x32xf32>
    %cst_20 = arith.constant dense<0xFF800000> : vector<32xf32>
    %46 = vector.multi_reduction <maximumf>, %45, %cst_20 [1] : vector<32x32xf32> to vector<32xf32>
    %cst_21 = arith.constant 0xFF800000 : f32
    %47 = vector.broadcast %cst_21 : f32 to vector<32xf32>
    %48 = arith.maximumf %47, %46 : vector<32xf32>
    %49 = vector.shape_cast %48 : vector<32xf32> to vector<32x1xf32>
    %50 = vector.broadcast %49 : vector<32x1xf32> to vector<32x32xf32>
    %51 = arith.subf %45, %50 : vector<32x32xf32>
    %52 = math.exp %51 : vector<32x32xf32>
    %cst_22 = arith.constant dense<0.000000e+00> : vector<32xf32>
    %53 = vector.multi_reduction <add>, %52, %cst_22 [1] : vector<32x32xf32> to vector<32xf32>
    %54 = vector.shape_cast %53 : vector<32xf32> to vector<32x1xf32>
    %55 = vector.broadcast %54 : vector<32x1xf32> to vector<32x32xf32>
    %56 = arith.divf %52, %55 : vector<32x32xf32>
    %57 = arith.truncf %56 : vector<32x32xf32> to vector<32x32xbf16>
    %58 = vector.broadcast %41 : vector<1x128xbf16> to vector<32x128xbf16>
    %59 = arith.mulf %18, %58 : vector<32x128xbf16>
    %cst_23 = arith.constant dense<0.000000e+00> : vector<32x128xf32>
    %60 = tpu.matmul %57, %59, %cst_23 {dimension_numbers = #tpu.dot_dimension_numbers<[1], [0], [0], [1], [0, 0, 1, 1], [], []>} : vector<32x32xbf16>, vector<32x128xbf16>, vector<32x128xf32> -> vector<32x128xf32>
    %61 = arith.addf %40, %60 : vector<32x128xf32>
    %c0_24 = arith.constant 0 : index
    %c0_25 = arith.constant 0 : index
    %c0_26 = arith.constant 0 : index
    %62 = vector.load %arg11[%c0_24, %c0_25, %c0_26] : memref<1x128x128xbf16, #tpu.memory_space<vmem>>, vector<1x128x128xbf16>
    %63 = vector.shape_cast %62 : vector<1x128x128xbf16> to vector<128x128xbf16>
    %64 = arith.truncf %61 : vector<32x128xf32> to vector<32x128xbf16>
    %cst_27 = arith.constant dense<0.000000e+00> : vector<32x128xf32>
    %65 = tpu.matmul %64, %63, %cst_27 {dimension_numbers = #tpu.dot_dimension_numbers<[1], [0], [0], [1], [0, 0, 1, 1], [], []>} : vector<32x128xbf16>, vector<128x128xbf16>, vector<32x128xf32> -> vector<32x128xf32>
    %c0_28 = arith.constant 0 : index
    %c0_29 = arith.constant 0 : index
    %c0_30 = arith.constant 0 : index
    %66 = vector.load %arg12[%c0_28, %c0_29, %c0_30] : memref<1x1x128xf32, #tpu.memory_space<vmem>>, vector<1x1x128xf32>
    %67 = vector.shape_cast %66 : vector<1x1x128xf32> to vector<1x128xf32>
    %68 = vector.broadcast %67 : vector<1x128xf32> to vector<32x128xf32>
    %69 = arith.addf %65, %68 : vector<32x128xf32>
    %70 = arith.addf %3, %69 : vector<32x128xf32>
    %c0_31 = arith.constant 0 : index
    %c0_32 = arith.constant 0 : index
    %c0_33 = arith.constant 0 : index
    %71 = vector.load %arg13[%c0_31, %c0_32, %c0_33] : memref<1x1x128xf32, #tpu.memory_space<vmem>>, vector<1x1x128xf32>
    %72 = vector.shape_cast %71 : vector<1x1x128xf32> to vector<1x128xf32>
    %c0_34 = arith.constant 0 : index
    %c0_35 = arith.constant 0 : index
    %c0_36 = arith.constant 0 : index
    %73 = vector.load %arg14[%c0_34, %c0_35, %c0_36] : memref<1x1x128xf32, #tpu.memory_space<vmem>>, vector<1x1x128xf32>
    %74 = vector.shape_cast %73 : vector<1x1x128xf32> to vector<1x128xf32>
    %cst_37 = arith.constant dense<0.000000e+00> : vector<32xf32>
    %75 = vector.multi_reduction <add>, %70, %cst_37 [1] : vector<32x128xf32> to vector<32xf32>
    %76 = vector.shape_cast %75 : vector<32xf32> to vector<32x1xf32>
    %cst_38 = arith.constant 1.280000e+02 : f32
    %77 = vector.broadcast %cst_38 : f32 to vector<32x1xf32>
    %78 = arith.divf %76, %77 : vector<32x1xf32>
    %79 = vector.broadcast %78 : vector<32x1xf32> to vector<32x128xf32>
    %80 = arith.subf %70, %79 : vector<32x128xf32>
    %81 = arith.mulf %80, %80 : vector<32x128xf32>
    %cst_39 = arith.constant dense<0.000000e+00> : vector<32xf32>
    %82 = vector.multi_reduction <add>, %81, %cst_39 [1] : vector<32x128xf32> to vector<32xf32>
    %83 = vector.shape_cast %82 : vector<32xf32> to vector<32x1xf32>
    %cst_40 = arith.constant 1.280000e+02 : f32
    %84 = vector.broadcast %cst_40 : f32 to vector<32x1xf32>
    %85 = arith.divf %83, %84 : vector<32x1xf32>
    %86 = vector.broadcast %78 : vector<32x1xf32> to vector<32x128xf32>
    %87 = arith.subf %70, %86 : vector<32x128xf32>
    %cst_41 = arith.constant 9.99999996E-13 : f32
    %88 = vector.broadcast %cst_41 : f32 to vector<32x1xf32>
    %89 = arith.addf %85, %88 : vector<32x1xf32>
    %90 = math.rsqrt %89 : vector<32x1xf32>
    %91 = vector.broadcast %90 : vector<32x1xf32> to vector<32x128xf32>
    %92 = arith.mulf %87, %91 : vector<32x128xf32>
    %93 = vector.broadcast %72 : vector<1x128xf32> to vector<32x128xf32>
    %94 = arith.mulf %92, %93 : vector<32x128xf32>
    %95 = vector.broadcast %74 : vector<1x128xf32> to vector<32x128xf32>
    %96 = arith.addf %94, %95 : vector<32x128xf32>
    %c0_42 = arith.constant 0 : index
    %c0_43 = arith.constant 0 : index
    %c0_44 = arith.constant 0 : index
    %97 = vector.load %arg15[%c0_42, %c0_43, %c0_44] : memref<1x128x256xbf16, #tpu.memory_space<vmem>>, vector<1x128x256xbf16>
    %98 = vector.shape_cast %97 : vector<1x128x256xbf16> to vector<128x256xbf16>
    %99 = arith.truncf %96 : vector<32x128xf32> to vector<32x128xbf16>
    %cst_45 = arith.constant dense<0.000000e+00> : vector<32x256xf32>
    %100 = tpu.matmul %99, %98, %cst_45 {dimension_numbers = #tpu.dot_dimension_numbers<[1], [0], [0], [1], [0, 0, 1, 1], [], []>} : vector<32x128xbf16>, vector<128x256xbf16>, vector<32x256xf32> -> vector<32x256xf32>
    %c0_46 = arith.constant 0 : index
    %c0_47 = arith.constant 0 : index
    %c0_48 = arith.constant 0 : index
    %101 = vector.load %arg16[%c0_46, %c0_47, %c0_48] : memref<1x1x256xf32, #tpu.memory_space<vmem>>, vector<1x1x256xf32>
    %102 = vector.shape_cast %101 : vector<1x1x256xf32> to vector<1x256xf32>
    %103 = vector.broadcast %102 : vector<1x256xf32> to vector<32x256xf32>
    %104 = arith.addf %100, %103 : vector<32x256xf32>
    %cst_49 = arith.constant 5.000000e-01 : f32
    %105 = vector.broadcast %cst_49 : f32 to vector<32x256xf32>
    %106 = arith.mulf %105, %104 : vector<32x256xf32>
    %cst_50 = arith.constant 4.471500e-02 : f32
    %107 = vector.broadcast %cst_50 : f32 to vector<32x256xf32>
    %108 = arith.mulf %107, %104 : vector<32x256xf32>
    %109 = arith.mulf %108, %104 : vector<32x256xf32>
    %110 = arith.mulf %109, %104 : vector<32x256xf32>
    %111 = arith.addf %104, %110 : vector<32x256xf32>
    %cst_51 = arith.constant 0.797884583 : f32
    %112 = vector.broadcast %cst_51 : f32 to vector<32x256xf32>
    %113 = arith.mulf %112, %111 : vector<32x256xf32>
    %114 = math.tanh %113 : vector<32x256xf32>
    %cst_52 = arith.constant 1.000000e+00 : f32
    %115 = vector.broadcast %cst_52 : f32 to vector<32x256xf32>
    %116 = arith.addf %115, %114 : vector<32x256xf32>
    %117 = arith.mulf %106, %116 : vector<32x256xf32>
    %c0_53 = arith.constant 0 : index
    %c0_54 = arith.constant 0 : index
    %c0_55 = arith.constant 0 : index
    %118 = vector.load %arg17[%c0_53, %c0_54, %c0_55] : memref<1x256x128xbf16, #tpu.memory_space<vmem>>, vector<1x256x128xbf16>
    %119 = vector.shape_cast %118 : vector<1x256x128xbf16> to vector<256x128xbf16>
    %120 = arith.truncf %117 : vector<32x256xf32> to vector<32x256xbf16>
    %cst_56 = arith.constant dense<0.000000e+00> : vector<32x128xf32>
    %121 = tpu.matmul %120, %119, %cst_56 {dimension_numbers = #tpu.dot_dimension_numbers<[1], [0], [0], [1], [0, 0, 1, 1], [], []>} : vector<32x256xbf16>, vector<256x128xbf16>, vector<32x128xf32> -> vector<32x128xf32>
    %c0_57 = arith.constant 0 : index
    %c0_58 = arith.constant 0 : index
    %c0_59 = arith.constant 0 : index
    %122 = vector.load %arg18[%c0_57, %c0_58, %c0_59] : memref<1x1x128xf32, #tpu.memory_space<vmem>>, vector<1x1x128xf32>
    %123 = vector.shape_cast %122 : vector<1x1x128xf32> to vector<1x128xf32>
    %124 = vector.broadcast %123 : vector<1x128xf32> to vector<32x128xf32>
    %125 = arith.addf %121, %124 : vector<32x128xf32>
    %126 = arith.addf %96, %125 : vector<32x128xf32>
    %c0_60 = arith.constant 0 : index
    %c0_61 = arith.constant 0 : index
    %c0_62 = arith.constant 0 : index
    %127 = vector.load %arg19[%c0_60, %c0_61, %c0_62] : memref<1x1x128xf32, #tpu.memory_space<vmem>>, vector<1x1x128xf32>
    %128 = vector.shape_cast %127 : vector<1x1x128xf32> to vector<1x128xf32>
    %c0_63 = arith.constant 0 : index
    %c0_64 = arith.constant 0 : index
    %c0_65 = arith.constant 0 : index
    %129 = vector.load %arg20[%c0_63, %c0_64, %c0_65] : memref<1x1x128xf32, #tpu.memory_space<vmem>>, vector<1x1x128xf32>
    %130 = vector.shape_cast %129 : vector<1x1x128xf32> to vector<1x128xf32>
    %cst_66 = arith.constant dense<0.000000e+00> : vector<32xf32>
    %131 = vector.multi_reduction <add>, %126, %cst_66 [1] : vector<32x128xf32> to vector<32xf32>
    %132 = vector.shape_cast %131 : vector<32xf32> to vector<32x1xf32>
    %cst_67 = arith.constant 1.280000e+02 : f32
    %133 = vector.broadcast %cst_67 : f32 to vector<32x1xf32>
    %134 = arith.divf %132, %133 : vector<32x1xf32>
    %135 = vector.broadcast %134 : vector<32x1xf32> to vector<32x128xf32>
    %136 = arith.subf %126, %135 : vector<32x128xf32>
    %137 = arith.mulf %136, %136 : vector<32x128xf32>
    %cst_68 = arith.constant dense<0.000000e+00> : vector<32xf32>
    %138 = vector.multi_reduction <add>, %137, %cst_68 [1] : vector<32x128xf32> to vector<32xf32>
    %139 = vector.shape_cast %138 : vector<32xf32> to vector<32x1xf32>
    %cst_69 = arith.constant 1.280000e+02 : f32
    %140 = vector.broadcast %cst_69 : f32 to vector<32x1xf32>
    %141 = arith.divf %139, %140 : vector<32x1xf32>
    %142 = vector.broadcast %134 : vector<32x1xf32> to vector<32x128xf32>
    %143 = arith.subf %126, %142 : vector<32x128xf32>
    %cst_70 = arith.constant 9.99999996E-13 : f32
    %144 = vector.broadcast %cst_70 : f32 to vector<32x1xf32>
    %145 = arith.addf %141, %144 : vector<32x1xf32>
    %146 = math.rsqrt %145 : vector<32x1xf32>
    %147 = vector.broadcast %146 : vector<32x1xf32> to vector<32x128xf32>
    %148 = arith.mulf %143, %147 : vector<32x128xf32>
    %149 = vector.broadcast %128 : vector<1x128xf32> to vector<32x128xf32>
    %150 = arith.mulf %148, %149 : vector<32x128xf32>
    %151 = vector.broadcast %130 : vector<1x128xf32> to vector<32x128xf32>
    %152 = arith.addf %150, %151 : vector<32x128xf32>
    %c0_71 = arith.constant 0 : index
    %c0_72 = arith.constant 0 : index
    %153 = vector.load %arg26[%c0_71, %c0_72] : memref<32x128xf32, #tpu.memory_space<vmem>>, vector<32x128xf32>
    tpu.vector_store %arg26[%c0_71, %c0_72], %152 {strides = array<i32>} : memref<32x128xf32, #tpu.memory_space<vmem>>, vector<32x128xf32>,
    %c1_i32 = arith.constant 1 : i32
    %154 = arith.cmpi eq, %arg0, %c1_i32 : i32
    %155 = arith.extui %154 : i1 to i32
    %c0_i32_73 = arith.constant 0 : i32
    %156 = arith.cmpi ne, %155, %c0_i32_73 : i32
    scf.if %156 {
      %c0_74 = arith.constant 0 : index
      %c0_75 = arith.constant 0 : index
      %157 = vector.load %arg5[%c0_74, %c0_75] : memref<8x32xbf16, #tpu.memory_space<vmem>>, vector<8x32xbf16>
      %158 = arith.truncf %152 : vector<32x128xf32> to vector<32x128xbf16>
      %cst_76 = arith.constant dense<0.000000e+00> : vector<8x128xf32>
      %159 = tpu.matmul %157, %158, %cst_76 {dimension_numbers = #tpu.dot_dimension_numbers<[1], [0], [0], [1], [0, 0, 1, 1], [], []>} : vector<8x32xbf16>, vector<32x128xbf16>, vector<8x128xf32> -> vector<8x128xf32>
      %c0_77 = arith.constant 0 : index
      %c0_78 = arith.constant 0 : index
      %160 = vector.load %arg21[%c0_77, %c0_78] : memref<128x128xbf16, #tpu.memory_space<vmem>>, vector<128x128xbf16>
      %161 = arith.truncf %159 : vector<8x128xf32> to vector<8x128xbf16>
      %cst_79 = arith.constant dense<0.000000e+00> : vector<8x128xf32>
      %162 = tpu.matmul %161, %160, %cst_79 {dimension_numbers = #tpu.dot_dimension_numbers<[1], [0], [0], [1], [0, 0, 1, 1], [], []>} : vector<8x128xbf16>, vector<128x128xbf16>, vector<8x128xf32> -> vector<8x128xf32>
      %c0_80 = arith.constant 0 : index
      %c0_81 = arith.constant 0 : index
      %163 = vector.load %arg22[%c0_80, %c0_81] : memref<1x128xf32, #tpu.memory_space<vmem>>, vector<1x128xf32>
      %164 = vector.broadcast %163 : vector<1x128xf32> to vector<8x128xf32>
      %165 = arith.addf %162, %164 : vector<8x128xf32>
      %166 = math.tanh %165 : vector<8x128xf32>
      %c0_82 = arith.constant 0 : index
      %c0_83 = arith.constant 0 : index
      %167 = vector.load %arg23[%c0_82, %c0_83] : memref<128x128xbf16, #tpu.memory_space<vmem>>, vector<128x128xbf16>
      %168 = arith.truncf %166 : vector<8x128xf32> to vector<8x128xbf16>
      %cst_84 = arith.constant dense<0.000000e+00> : vector<8x128xf32>
      %169 = tpu.matmul %168, %167, %cst_84 {dimension_numbers = #tpu.dot_dimension_numbers<[1], [0], [0], [1], [0, 0, 1, 1], [], []>} : vector<8x128xbf16>, vector<128x128xbf16>, vector<8x128xf32> -> vector<8x128xf32>
      %c0_85 = arith.constant 0 : index
      %c0_86 = arith.constant 0 : index
      %170 = vector.load %arg24[%c0_85, %c0_86] : memref<1x128xf32, #tpu.memory_space<vmem>>, vector<1x128xf32>
      %171 = vector.broadcast %170 : vector<1x128xf32> to vector<8x128xf32>
      %172 = arith.addf %169, %171 : vector<8x128xf32>
      %c0_87 = arith.constant 0 : index
      %c0_88 = arith.constant 0 : index
      %173 = vector.load %arg25[%c0_87, %c0_88] : memref<8x128xf32, #tpu.memory_space<vmem>>, vector<8x128xf32>
      tpu.vector_store %arg25[%c0_87, %c0_88], %172 {strides = array<i32>} : memref<8x128xf32, #tpu.memory_space<vmem>>, vector<8x128xf32>,
    } else {
    }
    return
  }
  func.func @transform_0(%arg0: i32) -> (i32, i32) {
    %c0_i32 = arith.constant 0 : i32
    %c0_i32_0 = arith.constant 0 : i32
    %c0_i32_1 = arith.constant 0 : i32
    return %c0_i32, %c0_i32_0 : i32, i32
  }
  func.func @transform_1(%arg0: i32) -> (i32, i32) {
    %c0_i32 = arith.constant 0 : i32
    %c0_i32_0 = arith.constant 0 : i32
    %c0_i32_1 = arith.constant 0 : i32
    return %c0_i32, %c0_i32_0 : i32, i32
  }
  func.func @transform_2(%arg0: i32) -> (i32, i32) {
    %c0_i32 = arith.constant 0 : i32
    %c0_i32_0 = arith.constant 0 : i32
    %c0_i32_1 = arith.constant 0 : i32
    return %c0_i32, %c0_i32_0 : i32, i32
  }
  func.func @transform_3(%arg0: i32) -> (i32, i32) {
    %c0_i32 = arith.constant 0 : i32
    %c0_i32_0 = arith.constant 0 : i32
    %c0_i32_1 = arith.constant 0 : i32
    return %c0_i32, %c0_i32_0 : i32, i32
  }
  func.func @transform_4(%arg0: i32) -> (i32, i32) {
    %c0_i32 = arith.constant 0 : i32
    %c0_i32_0 = arith.constant 0 : i32
    %c0_i32_1 = arith.constant 0 : i32
    return %c0_i32, %c0_i32_0 : i32, i32
  }
  func.func @transform_5(%arg0: i32) -> (i32, i32) {
    %c0_i32 = arith.constant 0 : i32
    %c0_i32_0 = arith.constant 0 : i32
    %c0_i32_1 = arith.constant 0 : i32
    return %c0_i32, %c0_i32_0 : i32, i32
  }
  func.func @transform_6(%arg0: i32) -> (i32, i32) {
    %c0_i32 = arith.constant 0 : i32
    %c0_i32_0 = arith.constant 0 : i32
    %c0_i32_1 = arith.constant 0 : i32
    return %c0_i32, %c0_i32_0 : i32, i32
  }
  func.func @transform_7(%arg0: i32) -> (i32, i32) {
    %c0_i32 = arith.constant 0 : i32
    %c0_i32_0 = arith.constant 0 : i32
    %c0_i32_1 = arith.constant 0 : i32
    return %c0_i32, %c0_i32_0 : i32, i32
  }
  func.func @transform_8(%arg0: i32) -> (i32, i32, i32) {
    %c0_i32 = arith.constant 0 : i32
    %c0_i32_0 = arith.constant 0 : i32
    %c0_i32_1 = arith.constant 0 : i32
    return %arg0, %c0_i32, %c0_i32_0 : i32, i32, i32
  }
  func.func @transform_9(%arg0: i32) -> (i32, i32, i32) {
    %c0_i32 = arith.constant 0 : i32
    %c0_i32_0 = arith.constant 0 : i32
    %c0_i32_1 = arith.constant 0 : i32
    return %arg0, %c0_i32, %c0_i32_0 : i32, i32, i32
  }
  func.func @transform_10(%arg0: i32) -> (i32, i32, i32) {
    %c0_i32 = arith.constant 0 : i32
    %c0_i32_0 = arith.constant 0 : i32
    %c0_i32_1 = arith.constant 0 : i32
    return %arg0, %c0_i32, %c0_i32_0 : i32, i32, i32
  }
  func.func @transform_11(%arg0: i32) -> (i32, i32, i32) {
    %c0_i32 = arith.constant 0 : i32
    %c0_i32_0 = arith.constant 0 : i32
    %c0_i32_1 = arith.constant 0 : i32
    return %arg0, %c0_i32, %c0_i32_0 : i32, i32, i32
  }
  func.func @transform_12(%arg0: i32) -> (i32, i32, i32) {
    %c0_i32 = arith.constant 0 : i32
    %c0_i32_0 = arith.constant 0 : i32
    %c0_i32_1 = arith.constant 0 : i32
    return %arg0, %c0_i32, %c0_i32_0 : i32, i32, i32
  }
  func.func @transform_13(%arg0: i32) -> (i32, i32, i32) {
    %c0_i32 = arith.constant 0 : i32
    %c0_i32_0 = arith.constant 0 : i32
    %c0_i32_1 = arith.constant 0 : i32
    return %arg0, %c0_i32, %c0_i32_0 : i32, i32, i32
  }
  func.func @transform_14(%arg0: i32) -> (i32, i32, i32) {
    %c0_i32 = arith.constant 0 : i32
    %c0_i32_0 = arith.constant 0 : i32
    %c0_i32_1 = arith.constant 0 : i32
    return %arg0, %c0_i32, %c0_i32_0 : i32, i32, i32
  }
  func.func @transform_15(%arg0: i32) -> (i32, i32, i32) {
    %c0_i32 = arith.constant 0 : i32
    %c0_i32_0 = arith.constant 0 : i32
    %c0_i32_1 = arith.constant 0 : i32
    return %arg0, %c0_i32, %c0_i32_0 : i32, i32, i32
  }
  func.func @transform_16(%arg0: i32) -> (i32, i32, i32) {
    %c0_i32 = arith.constant 0 : i32
    %c0_i32_0 = arith.constant 0 : i32
    %c0_i32_1 = arith.constant 0 : i32
    return %arg0, %c0_i32, %c0_i32_0 : i32, i32, i32
  }
  func.func @transform_17(%arg0: i32) -> (i32, i32, i32) {
    %c0_i32 = arith.constant 0 : i32
    %c0_i32_0 = arith.constant 0 : i32
    %c0_i32_1 = arith.constant 0 : i32
    return %arg0, %c0_i32, %c0_i32_0 : i32, i32, i32
  }
  func.func @transform_18(%arg0: i32) -> (i32, i32, i32) {
    %c0_i32 = arith.constant 0 : i32
    %c0_i32_0 = arith.constant 0 : i32
    %c0_i32_1 = arith.constant 0 : i32
    return %arg0, %c0_i32, %c0_i32_0 : i32, i32, i32
  }
  func.func @transform_19(%arg0: i32) -> (i32, i32, i32) {
    %c0_i32 = arith.constant 0 : i32
    %c0_i32_0 = arith.constant 0 : i32
    %c0_i32_1 = arith.constant 0 : i32
    return %arg0, %c0_i32, %c0_i32_0 : i32, i32, i32
  }
  func.func @transform_20(%arg0: i32) -> (i32, i32) {
    %c0_i32 = arith.constant 0 : i32
    %c0_i32_0 = arith.constant 0 : i32
    %c0_i32_1 = arith.constant 0 : i32
    return %c0_i32, %c0_i32_0 : i32, i32
  }
  func.func @transform_21(%arg0: i32) -> (i32, i32) {
    %c0_i32 = arith.constant 0 : i32
    %c0_i32_0 = arith.constant 0 : i32
    %c0_i32_1 = arith.constant 0 : i32
    return %c0_i32, %c0_i32_0 : i32, i32
  }
  func.func @transform_22(%arg0: i32) -> (i32, i32) {
    %c0_i32 = arith.constant 0 : i32
    %c0_i32_0 = arith.constant 0 : i32
    %c0_i32_1 = arith.constant 0 : i32
    return %c0_i32, %c0_i32_0 : i32, i32
  }
  func.func @transform_23(%arg0: i32) -> (i32, i32) {
    %c0_i32 = arith.constant 0 : i32
    %c0_i32_0 = arith.constant 0 : i32
    %c0_i32_1 = arith.constant 0 : i32
    return %c0_i32, %c0_i32_0 : i32, i32
  }
  func.func @transform_24(%arg0: i32) -> (i32, i32) {
    %c0_i32 = arith.constant 0 : i32
    %c0_i32_0 = arith.constant 0 : i32
    %c0_i32_1 = arith.constant 0 : i32
    return %c0_i32, %c0_i32_0 : i32, i32
  }
}

</mosaic_0001>

<bundles_post_ra>
// kernel: eq.29
= control target key start
LH: loop header
LB: loop body
LE: loop exit
PB: predicated region body
PF: predicated region fallthrough
CT: control target
= control target key end

     0   :  { %vm7_vm0 = vcmask 130048   ;;  %vm13_vm1 = vcmask 261248   ;;  %s39_s0 = inlined_call_operand.vmem [shape: s32[2,16], index: 0, kind: input, shape index: {}]   ;;  %s40_s1 = inlined_call_operand.vmem [shape: s32[32], index: 1, kind: output, shape index: {}]  }
   0x1   :  { %v4_v0 = vld [vmem:[%s39_s0] sm:$0x3]  ;;  %s22_s0 = smov 16  }
   0x2   :  { %5 = vst [vmem:[#allocation1] sm:$0x3] %v4_v0 }
   0x9   :  { %v10_v1 = vld [vmem:[#allocation1 + $0x1] sm:$0x1]   ;;  %v6_v2 = vld [vmem:[#allocation1] sm:$0x1]  }
   0xa   :  { %11 = vrot.lane.b32.xlu0 %v10_v1, %s22_s0  ;;  %8 = vst.msk [vmem:[#allocation0] sm:$0x1] %vm7_vm0, %v6_v2  }
  0x7c   :  { %v12_v3 = vpop.permute.xlu0 %11  }
  0x7d   :  { %14 = vst.msk [vmem:[#allocation0] sm:$0x1] %vm13_vm1, %v12_v3  }
  0x84   :  { %v17_v4 = vld [vmem:[#allocation0] sm:$0x1] }
  0x85   :  { %20 = vst [vmem:[%s40_s1] sm:$0x1] %v17_v4 }

// kernel: kobert_extended_forward.1
= control target key start
LH: loop header
LB: loop body
LE: loop exit
PB: predicated region body
PF: predicated region fallthrough
CT: control target
= control target key end

     0   :  { %s4585_s0 = inlined_call_operand.vmem [shape: bf16[32,128], index: 0, kind: input, shape index: {}]   ;;  %s4586_s1 = inlined_call_operand.vmem [shape: f32[32,128], index: 1, kind: input, shape index: {}]   ;;  %s4587_s2 = inlined_call_operand.vmem [shape: f32[32,32], index: 2, kind: input, shape index: {}]   ;;  %s4588_s3 = inlined_call_operand.vmem [shape: bf16[2,128], index: 3, kind: input, shape index: {}]   ;;  %s4589_s4 = inlined_call_operand.vmem [shape: bf16[8,32], index: 4, kind: input, shape index: {}]   ;;  %s4590_s5 = inlined_call_operand.hbm [shape: bf16[128,128], index: 5, kind: input, shape index: {}]   ;;  %s4591_s6 = inlined_call_operand.vmem [shape: f32[1,128], index: 6, kind: input, shape index: {}]   ;;  %s4592_s7 = inlined_call_operand.vmem [shape: f32[1,128], index: 7, kind: input, shape index: {}]   ;;  %s4593_s8 = inlined_call_operand.hbm [shape: bf16[2,128,384], index: 8, kind: input, shape index: {}]   ;;  %s4594_s9 = inlined_call_operand.vmem [shape: f32[2,1,384], index: 9, kind: input, shape index: {}]   ;;  %s4595_s10 = inlined_call_operand.vmem [shape: bf16[2,128,128], index: 10, kind: input, shape index: {}]   ;;  %s4596_s11 = inlined_call_operand.vmem [shape: f32[2,1,128], index: 11, kind: input, shape index: {}]   ;;  %s4597_s12 = inlined_call_operand.vmem [shape: f32[2,1,128], index: 12, kind: input, shape index: {}]   ;;  %s4598_s13 = inlined_call_operand.vmem [shape: f32[2,1,128], index: 13, kind: input, shape index: {}]   ;;  %s4599_s14 = inlined_call_operand.hbm [shape: bf16[2,128,256], index: 14, kind: input, shape index: {}]   ;;  %s4600_s15 = inlined_call_operand.vmem [shape: f32[2,1,256], index: 15, kind: input, shape index: {}]   ;;  %s4601_s16 = inlined_call_operand.hbm [shape: bf16[2,256,128], index: 16, kind: input, shape index: {}]   ;;  %s4602_s17 = inlined_call_operand.vmem [shape: f32[2,1,128], index: 17, kind: input, shape index: {}]   ;;  %s4603_s18 = inlined_call_operand.vmem [shape: f32[2,1,128], index: 18, kind: input, shape index: {}]   ;;  %s4604_s19 = inlined_call_operand.vmem [shape: f32[2,1,128], index: 19, kind: input, shape index: {}]   ;;  %s4605_s20 = inlined_call_operand.hbm [shape: bf16[128,128], index: 20, kind: input, shape index: {}]   ;;  %s4606_s21 = inlined_call_operand.vmem [shape: f32[1,128], index: 21, kind: input, shape index: {}]   ;;  %s4607_s22 = inlined_call_operand.hbm [shape: bf16[128,128], index: 22, kind: input, shape index: {}]   ;;  %s4608_s23 = inlined_call_operand.vmem [shape: f32[1,128], index: 23, kind: input, shape index: {}]   ;;  %s4609_s24 = inlined_call_operand.vmem [shape: f32[8,128], index: 24, kind: output, shape index: {}]  }
   0x1   :  { %4623 = sst [smem:[#allocation20_spill]] %s4585_s0 }
   0x2   :  { %4624 = sst [smem:[#allocation21_spill]] %s4586_s1 }
   0x3   :  { %4625 = sst [smem:[#allocation22_spill]] %s4587_s2 }
   0x4   :  { %4626 = sst [smem:[#allocation23_spill]] %s4588_s3 }
   0x5   :  { %4627 = sst [smem:[#allocation24_spill]] %s4589_s4 }
   0x6   :  { %4628 = sst [smem:[#allocation25_spill]] %s4590_s5 }
   0x7   :  { %4629 = sst [smem:[#allocation26_spill]] %s4591_s6 }
   0x8   :  { %4630 = sst [smem:[#allocation27_spill]] %s4592_s7 }
   0x9   :  { %4631 = sst [smem:[#allocation28_spill]] %s4593_s8 }
   0xa   :  { %4632 = sst [smem:[#allocation29_spill]] %s4594_s9 }
   0xb   :  { %4633 = sst [smem:[#allocation30_spill]] %s4595_s10 }
   0xc   :  { %4634 = sst [smem:[#allocation31_spill]] %s4597_s12 }
   0xd   :  { %4635 = sst [smem:[#allocation32_spill]] %s4598_s13 }
   0xe   :  { %4636 = sst [smem:[#allocation33_spill]] %s4599_s14 }
   0xf   :  { %4637 = sst [smem:[#allocation34_spill]] %s4600_s15 }
  0x10   :  { %4638 = sst [smem:[#allocation35_spill]] %s4601_s16 }
  0x11   :  { %4639 = sst [smem:[#allocation36_spill]] %s4602_s17 }
  0x12   :  { %4640 = sst [smem:[#allocation37_spill]] %s4603_s18 }
  0x13   :  { %4641 = sst [smem:[#allocation38_spill]] %s4604_s19 }
  0x14   :  { %4642 = sst [smem:[#allocation39_spill]] %s4605_s20 }
  0x15   :  { %4643 = sst [smem:[#allocation40_spill]] %s4606_s21 }
  0x16   :  { %4644 = sst [smem:[#allocation41_spill]] %s4607_s22 }
  0x17   :  { %4645 = sst [smem:[#allocation42_spill]] %s4608_s23 }
  0x18   :  { %4646 = sst [smem:[#allocation43_spill]] %s4609_s24 }
  0x19   :  { %29 = vsyncpa [#allocation4], 0 }
  0x1a   :  { %30 = vsyncpa [#allocation6], 0 }
  0x1b   :  { %32 = vsyncpa [#allocation6 + $0x1], 0 }
  0x1c   :  { %33 = vsyncpa [#allocation9], 0 }
  0x1d   :  { %35 = vsyncpa [#allocation9 + $0x1], 0 }
  0x1e   :  { %36 = vsyncpa [#allocation12], 0  ;;  %s3922_s5 = smov 0   ;;  %s3924_s26 = smov 0  }
  0x1f   :  { %s3926_s27 = smov 0   ;;  %s3928_s28 = smov 0  }
  0x20 LB: > { %s3941_s6 = sadd.s32 4294967295, %s3784_s28   ;;  %p230_p0 = scmp.ne.s32.totalorder %s3776_s26, %s3772_s5  ;;  %s3784_s28 = sphi %s3928_s28, %s4696_s28   ;;  %s3780_s27 = sphi %s3926_s27, %s4700_s27   ;;  %s3776_s26 = sphi %s3924_s26, %s4699_s26   ;;  %s3772_s5 = sphi %s3922_s5, %s4698_s5  }
  0x21   : > { %p231_p1 = scmp.eq.s32.totalorder %s3941_s6, 0  ;;  %p2883_p2 = scmp.ge.s32.totalorder %s3784_s28, 1 }
  0x22   : > { %p632_p3 = scmp.lt.s32.totalorder %s3784_s28, 3  ;;  %p2884_p4 = scmp.ne.s32.totalorder %s3941_s6, 0 }
  0x23   : > { %p3950_p5 = por %p231_p1, %p230_p0  ;;  %s4649_s20 = sld [smem:[#allocation39_spill]] }
  0x24   : > { %p3954_p6 = pnand %p2883_p2, %p632_p3  ;;  %s3786_s3 = smov [#allocation10]  }
  0x25   : > { %s680_s25 = sshll.u32 %s3786_s3, 4  ;;  %s3970_s4 = sadd.s32 1, %s3784_s28   ;;  %s681_s25 = int_to_ptr.vmem [resolvable:$true] %s680_s25 }
  0x26   : > { %p3396_p7 = pneg %p3954_p6  ;;  %4651 = sst [smem:[#allocation18_spill]] %s3970_s4 }
  0x27   : > { %s4614_s1 = smov 64   ;;  %s4616_s5 = smov 4  }
  0x28   : > { %p3965_p8 = pnand %p3396_p7, %p231_p1  ;;  %s214_s0 = ssub.s32 %s3784_s28, %s3970_s4 }
  0x29   : > { %s678_s30 = sshll.u32 %s4649_s20, 4  ;;  %s217_s7 = sadd.s32 1, %s3780_s27  ;;  %s679_s30 = int_to_ptr.hbm [resolvable:$true] %s678_s30 }
  0x2a   : > { %3402 = dma.hbm_to_vmem [thread:$0]  (!%p3965_p8), %s679_s30, 1024, %s681_s25, [#allocation9], %s4614_s1, %s4614_s1, %s4616_s5  }
  0x2b   : > { %p215_p9 = scmp.eq.s32.totalorder %s214_s0, 0  ;;  %p224_p10 = scmp.ne.s32.totalorder %s3780_s27, %s3776_s26 }
  0x2c   : > { %p225_p11 = scmp.eq.s32.totalorder %s3784_s28, 0  ;;  %p3419_p12 = scmp.lt.s32.totalorder %s3784_s28, 2 }
  0x2d   : > { %s3985_s3 = scalar_select %p215_p9, %s3780_s27, %s217_s7  }
  0x2e   : > { %p226_p13 = por %p225_p11, %p224_p10  ;;  %s4621_s20 = sand.u32 1, %s3784_s28  }
  0x2f   : > { %4652 = sst [smem:[#allocation19_spill]] %s3985_s3  ;;  %s4620_s24 = sand.u32 1, %s3780_s27  }
  0x30   : > { %s3374_s23 = smul.u32 192, %s4620_s24  ;;  %p3991_p0 = pnand %p3419_p12, %p226_p13 }
  0x31   : > { %s3375_s30 = smul.u32 192, %s3784_s28  ;;  %s4654_s1 = sld [smem:[#allocation28_spill]] }
  0x32   : > { %s718_s4 = scalar_lea.vmem [#allocation5], %s3374_s23  ;;  %s4001_s3 = scalar_lea.sflag [#allocation6], %s4621_s20 }
  0x33   : > { %s726_s19 = sshll.u32 %s718_s4, 4  ;;  %p3588_p3 = pneg %p3991_p0  ;;  %s727_s19 = int_to_ptr.vmem [resolvable:$true] %s726_s19 }
  0x37   : > { %s723_s5 = scalar_lea.hbm %s4654_s1, %s3375_s30  ;;  %s3591_s23 = scalar_lea.hbm %s4654_s1, 384 }
  0x38   : > { %s724_s7 = sshll.u32 %s723_s5, 4  ;;  %s725_s7 = int_to_ptr.hbm [resolvable:$true] %s724_s7 }
  0x39   : > { %s3584_s24 = sshra.s32 %s725_s7, 4  ;;  %s3585_s24 = int_to_ptr.hbm [resolvable:$true] %s3584_s24 }
  0x3a   : > { %s3586_s18 = scalar_lea.hbm %s3585_s24, 192  ;;  %p3592_p10 = scmp.lt.s32.totalorder %s3585_s24, %s4654_s1 }
  0x3b   : > { %p3587_p2 = scmp.ne.s32.totalorder %s3585_s24, %s3586_s18  ;;  %p3593_p11 = scmp.lt.s32.totalorder %s3591_s23, %s3586_s18 }
  0x3d   : > { %p3589_p7 = pnand %p3588_p3, %p3587_p2  ;;  %p3594_p12 = por %p3593_p11, %p3592_p10 }
  0x3f   : > { %p3590_p9 = pneg %p3589_p7 }
  0x41   : > { %p3595_p13 = pnand %p3594_p12, %p3590_p9 }
  0x43   : > { %3598 = shalt.err (!%p3595_p13)
}
  0x44   : > { %s3789_s0 = smov 192   ;;  %s3790_s20 = smov 12  }
  0x45   : > { %3409 = dma.hbm_to_vmem [thread:$0]  (!%p3991_p0), %s725_s7, 3072, %s727_s19, %s4001_s3, %s3789_s0, %s3789_s0, %s3790_s20  }
  0x46   : > { %s4655_s25 = sand.u32 1, %s3780_s27   ;;  %s4656_s24 = sld [smem:[#allocation25_spill]] }
  0x47   : > { %s4019_s30 = sshll.u32 %s4655_s25, 7  ;;  %s3791_s23 = smov [#allocation3]  }
  0x48   : > { %s660_s5 = sshll.u32 %s3791_s23, 4  ;;  %s4657_s22 = sld [smem:[#allocation41_spill]]  ;;  %s661_s5 = int_to_ptr.vmem [resolvable:$true] %s660_s5 }
  0x49   : > { %s4658_s12 = smov 4   ;;  %s4659_s9 = smov 64  }
  0x4a   : > { %s3792_s19 = smov [#allocation11]   ;;  %s3273_s17 = sshll.u32 %s3784_s28, 7 }
  0x4b   : > { %s697_s20 = sshll.u32 %s3792_s19, 4  ;;  %s4660_s14 = sld [smem:[#allocation33_spill]]  ;;  %s698_s20 = int_to_ptr.vmem [resolvable:$true] %s697_s20 }
  0x4c   : > { %s658_s18 = sshll.u32 %s4656_s24, 4  ;;  %s773_s1 = scalar_lea.vmem [#allocation7], %s4019_s30  ;;  %s659_s18 = int_to_ptr.hbm [resolvable:$true] %s658_s18 }
  0x4d   : > { %3399 = dma.hbm_to_vmem [thread:$0]  (!%p3965_p8), %s659_s18, 1024, %s661_s5, [#allocation4], %s4659_s9, %s4659_s9, %s4658_s12  }
  0x4e   : > { %s695_s13 = sshll.u32 %s4657_s22, 4  ;;  %s781_s25 = sshll.u32 %s773_s1, 4  ;;  %s696_s13 = int_to_ptr.hbm [resolvable:$true] %s695_s13  ;;  %s782_s25 = int_to_ptr.vmem [resolvable:$true] %s781_s25 }
  0x4f   : > { %3405 = dma.hbm_to_vmem [thread:$0]  (!%p3965_p8), %s696_s13, 1024, %s698_s20, [#allocation12], %s4659_s9, %s4659_s9, %s4658_s12  }
  0x51   : > { %s778_s15 = scalar_lea.hbm %s4660_s14, %s3273_s17  ;;  %s3681_s13 = scalar_lea.hbm %s4660_s14, 256 }
  0x52   : > { %s779_s4 = sshll.u32 %s778_s15, 4  ;;  %s780_s4 = int_to_ptr.hbm [resolvable:$true] %s779_s4 }
  0x53   : > { %s3674_s24 = sshra.s32 %s780_s4, 4  ;;  %s3675_s24 = int_to_ptr.hbm [resolvable:$true] %s3674_s24 }
  0x54   : > { %s3676_s18 = scalar_lea.hbm %s3675_s24, 128  ;;  %p3682_p8 = scmp.lt.s32.totalorder %s3675_s24, %s4660_s14 }
  0x55   : > { %p3677_p2 = scmp.ne.s32.totalorder %s3675_s24, %s3676_s18  ;;  %p3683_p10 = scmp.lt.s32.totalorder %s3681_s13, %s3676_s18 }
  0x57   : > { %p3679_p7 = pnand %p3677_p2, %p3588_p3  ;;  %p3684_p11 = por %p3683_p10, %p3682_p8 }
  0x59   : > { %p3680_p9 = pneg %p3679_p7 }
  0x5b   : > { %p3685_p12 = pnand %p3684_p11, %p3680_p9 }
  0x5d   : > { %3688 = shalt.err (!%p3685_p12)
}
  0x5e   : > { %s3793_s20 = smov 128   ;;  %s3794_s7 = smov 8  }
  0x5f   : > { %3412 = dma.hbm_to_vmem [thread:$0]  (!%p3991_p0), %s780_s4, 2048, %s782_s25, %s4001_s3, %s3793_s20, %s3793_s20, %s3794_s7  }
  0x60   : > { %s4661_s16 = sld [smem:[#allocation35_spill]]  ;;  %s802_s8 = scalar_lea.vmem [#allocation8], %s4019_s30 }
  0x61   : > { %s810_s23 = sshll.u32 %s802_s8, 4  ;;  %s4662_s18 = sand.u32 1, %s3784_s28   ;;  %s811_s23 = int_to_ptr.vmem [resolvable:$true] %s810_s23 }
  0x62   : > { %s799_s13 = scalar_lea.sflag [#allocation9], %s4662_s18 }
  0x66   : > { %s807_s1 = scalar_lea.hbm %s4661_s16, %s3273_s17  ;;  %s3711_s4 = scalar_lea.hbm %s4661_s16, 256 }
  0x67   : > { %s808_s24 = sshll.u32 %s807_s1, 4  ;;  %s809_s24 = int_to_ptr.hbm [resolvable:$true] %s808_s24 }
  0x68   : > { %s3704_s5 = sshra.s32 %s809_s24, 4  ;;  %s3705_s5 = int_to_ptr.hbm [resolvable:$true] %s3704_s5 }
  0x69   : > { %s3706_s19 = scalar_lea.hbm %s3705_s5, 128  ;;  %p3712_p9 = scmp.lt.s32.totalorder %s3705_s5, %s4661_s16 }
  0x6a   : > { %p3707_p13 = scmp.ne.s32.totalorder %s3705_s5, %s3706_s19  ;;  %p3713_p8 = scmp.lt.s32.totalorder %s3711_s4, %s3706_s19 }
  0x6c   : > { %p3709_p2 = pnand %p3707_p13, %p3588_p3  ;;  %p3714_p10 = por %p3713_p8, %p3712_p9 }
  0x6e   : > { %p3710_p7 = pneg %p3709_p2 }
  0x70   : > { %p3715_p11 = pnand %p3714_p10, %p3710_p7 }
  0x72   : > { %3718 = shalt.err (!%p3715_p11)
}
  0x73   : > { %3415 = dma.hbm_to_vmem [thread:$0]  (!%p3991_p0), %s809_s24, 2048, %s811_s23, %s799_s13, %s4659_s9, %s4659_s9, %s4658_s12  }
  0x74   : > { %840 = sbr.rel (%p3954_p6) target bundleno = 2781 (0xadd), region = 116 }
  0x79   : > { %3751 = dma.done.wait (%p231_p1), [#allocation4], 1024  }
  0x7a   : > { %3753 = vsyncadd (%p231_p1), [#allocation4], 4294966272  ;;  %s847_s28 = sand.u32 1, %s3941_s6   ;;  %s849_s20 = sand.u32 1, %s3776_s26  }
  0x7b   : > { %s3376_s7 = smul.u32 192, %s849_s20  ;;  %s848_s21 = scalar_lea.sflag [#allocation6], %s847_s28 }
  0x7d   : > { %s4082_s0 = scalar_lea.vmem [#allocation5], %s3376_s7 }
  0x7e   : > { %3755 = dma.done.wait (%p3950_p5), %s848_s21, 5120  }
  0x7f   : > { %3757 = vsyncadd (%p3950_p5), %s848_s21, 4294962176  ;;  %s2897_s9 = sshll.u32 %s849_s20, 7  ;;  %s868_s29 = scalar_lea.sflag [#allocation9], %s847_s28 }
  0x80   : > { %s4088_s12 = scalar_lea.vmem [#allocation7], %s2897_s9  ;;  %s4090_s15 = scalar_lea.vmem [#allocation8], %s2897_s9 }
  0x81   : > { %3759 = dma.done.wait (%p3950_p5), %s868_s29, 2048  }
  0x82   : > { %3761 = vsyncadd (%p3950_p5), %s868_s29, 4294965248 }
  0x83   : > { %3763 = dma.done.wait (%p231_p1), [#allocation9], 1024  }
  0x84   : > { %3765 = vsyncadd (%p231_p1), [#allocation9], 4294966272 }
  0x85   : > { %3767 = dma.done.wait (%p231_p1), [#allocation12], 1024  }
  0x86   : > { %3769 = vsyncadd (%p231_p1), [#allocation12], 4294966272  ;;  %p983_p6 = scmp.lt.s32.totalorder %s3941_s6, 1  ;;  %s4663_s10 = sld [smem:[#allocation30_spill]] }
  0x87   : > { %s4664_s4 = sld [smem:[#allocation29_spill]] }
  0x88   : > { %s4106_s1 = scalar_select %p983_p6, %s3941_s6, 1 }
  0x89   : > { %s4666_s29 = sld [smem:[#allocation32_spill]] }
  0x8a   : > { %s3377_s2 = smul.u32 3, %s4106_s1  ;;  %s3275_s8 = sshll.u32 %s4106_s1, 6 }
  0x8b   : > { %s2903_s23 = sshll.u32 %s4106_s1, 1  ;;  %s4668_s19 = sld [smem:[#allocation36_spill]] }
  0x8c   : > { %s4113_s18 = scalar_lea.vmem %s4663_s10, %s3275_s8  ;;  %s4667_s10 = sld [smem:[#allocation34_spill]] }
  0x8d   : > { %s4122_s17 = scalar_lea.vmem %s4664_s4, %s3377_s2  ;;  %s4669_s4 = sld [smem:[#allocation37_spill]] }
  0x8e   : > { %s4670_s20 = sld [smem:[#allocation38_spill]] }
  0x8f   : > { %s1000_s14 = scalar_lea.vmem %s4666_s29, %s4106_s1  ;;  %s4671_s21 = sld [smem:[#allocation20_spill]] (!%p2884_p4) }
  0x90   : > { %1018 = sbr.rel (%p2884_p4) target bundleno = 585 (0x249), region = 144  ;;  %s4672_s24 = sld [smem:[#allocation21_spill]] (!%p2884_p4) }
  0x91   : > { %s1007_s3 = scalar_lea.vmem %s4668_s19, %s4106_s1  ;;  %s4674_s29 = sld [smem:[#allocation27_spill]] (!%p2884_p4) }
  0x92   : > { %s4136_s16 = scalar_lea.vmem %s4667_s10, %s2903_s23  ;;  %s4673_s10 = sld [smem:[#allocation26_spill]] (!%p2884_p4) }
  0x93   : > { %s1010_s22 = scalar_lea.vmem %s4669_s4, %s4106_s1 }
  0x94   : > { %s1013_s7 = scalar_lea.vmem %s4670_s20, %s4106_s1 }
  0x95   : > { %v3285_v0 = vld [vmem:[#allocation3 + $0x38] sm:$0xff]  ;;  %v3284_v1 = vld [vmem:[#allocation3 + $0x30] sm:$0xff]  ;;  %v3283_v2 = vld [vmem:[#allocation3 + $0x28] sm:$0xff]  ;;  %v3795_v22 = vmov 128.0  }
  0x96   : > { %1103 = vmatpush.bf16.msra.mxu0 %v3285_v0  ;;  %3366 = vmatpush.bf16.msra.mxu1 %v3285_v0  ;;  %v3282_v3 = vld [vmem:[#allocation3 + $0x20] sm:$0xff]  ;;  %v3281_v4 = vld [vmem:[#allocation3 + $0x18] sm:$0xff]  ;;  %v3280_v5 = vld [vmem:[#allocation3 + $0x10] sm:$0xff]  ;;  %3468 = vrcp.f32 %v3795_v22 }
  0x97   : > { %v3279_v6 = vld [vmem:[#allocation3 + $0x8] sm:$0xff]  ;;  %v3278_v7 = vld [vmem:[#allocation3] sm:$0xff]  ;;  %v1041_v11 = vld [vmem:[%s4672_s24 + $0x10] sm:$0xff] }
  0x98   : > { %v3276_v8 = vld [vmem:[%s4671_s21] sm:$0xff]  ;;  %v3277_v9 = vld [vmem:[%s4671_s21 + $0x8] sm:$0xff]  ;;  %v1042_v17 = vld [vmem:[%s4672_s24 + $0x18] sm:$0xff] }
  0x99   : > { %v1039_v10 = vld [vmem:[%s4672_s24] sm:$0xff]  ;;  %v1040_v16 = vld [vmem:[%s4672_s24 + $0x8] sm:$0xff] }
  0x9a   : > { %1104 = vmatpush.bf16.msra.mxu0 %v3284_v1  ;;  %3367 = vmatpush.bf16.msra.mxu1 %v3284_v1 }
  0x9c   : > { %v3469_v23 = vpop.eup %3468 }
  0x9d   : > { %v1133_v24 = vmul.f32 128.0, %v3469_v23  ;;  %vm1137_vm0 = vweird.f32 %v3469_v23 }
  0x9e   : > { %1105 = vmatpush.bf16.msra.mxu0 %v3283_v2  ;;  %3368 = vmatpush.bf16.msra.mxu1 %v3283_v2 }
  0x9f   : > { %v1134_v25 = vsub.f32 1.0, %v1133_v24 }
  0xa1   : > { %v1135_v26 = vmul.f32 %v3469_v23, %v1134_v25 }
  0xa2   : > { %1106 = vmatpush.bf16.msra.mxu0 %v3282_v3  ;;  %3369 = vmatpush.bf16.msra.mxu1 %v3282_v3 }
  0xa3   : > { %v1136_v27 = vadd.f32 %v3469_v23, %v1135_v26 }
  0xa5   : > { %v1138_v28 = vsel %vm1137_vm0, %v3469_v23, %v1136_v27 }
  0xa6   : > { %1107 = vmatpush.bf16.msra.mxu0 %v3281_v4  ;;  %3370 = vmatpush.bf16.msra.mxu1 %v3281_v4 }
  0xaa   : > { %1108 = vmatpush.bf16.msra.mxu0 %v3280_v5  ;;  %3371 = vmatpush.bf16.msra.mxu1 %v3280_v5 }
  0xae   : > { %1109 = vmatpush.bf16.msra.mxu0 %v3279_v6  ;;  %3372 = vmatpush.bf16.msra.mxu1 %v3279_v6 }
  0xb2   : > { %1110 = vmatpush.bf16.msra.mxu0 %v3278_v7  ;;  %3373 = vmatpush.bf16.msra.mxu1 %v3278_v7  ;;  %v3466_v7 = vld [vmem:[%s4673_s10] ss:$0 sm:$0xff] }
  0xb5   : > { %1111 = vmatmul.bf16.vlgmr.msra.gmra.mxu0 %v3276_v8  ;;  %1116 = vmatmul.bf16.vlgmr.msra.gmra.mxu1 %v3277_v9 }
 0x132   : > { %v1112_v12 = vpop.f32.mrf.mxu0  ;;  %v1117_v13 = vpop.f32.mrf.mxu1 }
 0x133   : > { %v1113_v14 = vadd.f32 %v1112_v12, %v1039_v10  ;;  %v1118_v15 = vadd.f32 %v1117_v13, %v1041_v11  ;;  %v3467_v12 = vld [vmem:[%s4674_s29] ss:$0 sm:$0xff] }
 0x135   : > { %1128 = vadd.xlane.f32.xlu1 %v1118_v15  ;;  %1124 = vadd.xlane.f32.xlu0 %v1113_v14 }
 0x13a   : > { %v1114_v18 = vpop.f32.mrf.mxu0  ;;  %v1119_v19 = vpop.f32.mrf.mxu1 }
 0x13b   : > { %v1115_v20 = vadd.f32 %v1114_v18, %v1040_v16  ;;  %v1120_v21 = vadd.f32 %v1119_v19, %v1042_v17 }
 0x13d   : > { %1130 = vadd.xlane.f32.xlu1 %v1120_v21  ;;  %1126 = vadd.xlane.f32.xlu0 %v1115_v20 }
 0x1a8   : > { %v1129_v29 = vpop.xlane.xlu1 %1128  ;;  %v1125_v30 = vpop.xlane.xlu0 %1124 }
 0x1a9   : > { %v1141_v31 = vmul.f32 %v1138_v28, %v1129_v29  ;;  %v1139_v32 = vmul.f32 %v1138_v28, %v1125_v30 }
 0x1ab   : > { %v1145_v33 = vsub.f32 %v1118_v15, %v1141_v31  ;;  %v1143_v34 = vsub.f32 %v1113_v14, %v1139_v32 }
 0x1ad   : > { %v1149_v35 = vmul.f32 %v1145_v33, %v1145_v33  ;;  %v1147_v36 = vmul.f32 %v1143_v34, %v1143_v34 }
 0x1af   : > { %1155 = vadd.xlane.f32.xlu0 %v1149_v35  ;;  %1151 = vadd.xlane.f32.xlu2 %v1147_v36 }
 0x1b0   : > { %v1131_v37 = vpop.xlane.xlu1 %1130  ;;  %v1127_v38 = vpop.xlane.xlu0 %1126 }
 0x1b1   : > { %v1142_v39 = vmul.f32 %v1138_v28, %v1131_v37  ;;  %v1140_v40 = vmul.f32 %v1138_v28, %v1127_v38 }
 0x1b3   : > { %v4170_v41 = vsub.f32 %v1120_v21, %v1142_v39  ;;  %v4172_v42 = vsub.f32 %v1115_v20, %v1140_v40 }
 0x1b5   : > { %v1150_v43 = vmul.f32 %v4170_v41, %v4170_v41  ;;  %v1148_v44 = vmul.f32 %v4172_v42, %v4172_v42 }
 0x1b7   : > { %1157 = vadd.xlane.f32.xlu1 %v1150_v43  ;;  %1153 = vadd.xlane.f32.xlu2 %v1148_v44 }
 0x222   : > { %v1152_v45 = vpop.xlane.xlu2 %1151  ;;  %v1156_v46 = vpop.xlane.xlu0 %1155 }
 0x223   : > { %v1159_v47 = vmul.f32 %v1152_v45, %v1138_v28  ;;  %v1161_v48 = vmul.f32 %v1156_v46, %v1138_v28 }
 0x225   : > { %v1163_v49 = vadd.f32 1e-12, %v1159_v47  ;;  %v1165_v50 = vadd.f32 1e-12, %v1161_v48 }
 0x227   : > { %3470 = vrsqrt.f32 %v1163_v49  ;;  %vm1173_vm3 = vweird.f32 %v1163_v49  ;;  %vm1193_vm5 = vweird.f32 %v1165_v50 }
 0x228   : > { %3472 = vrsqrt.f32 %v1165_v50 }
 0x22a   : > { %v1158_v51 = vpop.xlane.xlu1 %1157  ;;  %v1154_v52 = vpop.xlane.xlu2 %1153 }
 0x22b   : > { %v1162_v53 = vmul.f32 %v1158_v51, %v1138_v28  ;;  %v1160_v54 = vmul.f32 %v1154_v52, %v1138_v28 }
 0x22d   : > { %v3471_v55 = vpop.eup %3470  ;;  %v1166_v56 = vadd.f32 1e-12, %v1162_v53  ;;  %v1164_v57 = vadd.f32 1e-12, %v1160_v54 }
 0x22e   : > { %v3473_v58 = vpop.eup %3472  ;;  %v1168_v59 = vmul.f32 %v3471_v55, %v1163_v49  ;;  %vm1174_vm1 = vweird.f32 %v3471_v55 }
 0x22f   : > { %v1188_v60 = vmul.f32 %v3473_v58, %v1165_v50  ;;  %3474 = vrsqrt.f32 %v1166_v56  ;;  %vm1194_vm2 = vweird.f32 %v3473_v58  ;;  %vm1175_vm4 = vmor %vm1173_vm3, %vm1174_vm1  ;;  %vm1203_vm9 = vweird.f32 %v1166_v56 }
 0x230   : > { %v1169_v61 = vmul.f32 %v3471_v55, %v1168_v59  ;;  %3476 = vrsqrt.f32 %v1164_v57  ;;  %vm1195_vm6 = vmor %vm1193_vm5, %vm1194_vm2  ;;  %vm1183_vm11 = vweird.f32 %v1164_v57 }
 0x231   : > { %v1189_v62 = vmul.f32 %v3473_v58, %v1188_v60 }
 0x232   : > { %v1170_v63 = vmul.f32 0.5, %v1169_v61 }
 0x233   : > { %v1190_v0 = vmul.f32 0.5, %v1189_v62 }
 0x234   : > { %v1171_v1 = vsub.f32 1.5, %v1170_v63 }
 0x235   : > { %v3475_v2 = vpop.eup %3474  ;;  %v1191_v3 = vsub.f32 1.5, %v1190_v0 }
 0x236   : > { %v3477_v4 = vpop.eup %3476  ;;  %v1172_v5 = vmul.f32 %v3471_v55, %v1171_v1  ;;  %v1198_v6 = vmul.f32 %v3475_v2, %v1166_v56  ;;  %vm1204_vm7 = vweird.f32 %v3475_v2 }
 0x237   : > { %v1192_v8 = vmul.f32 %v3473_v58, %v1191_v3  ;;  %v1178_v9 = vmul.f32 %v3477_v4, %v1164_v57  ;;  %vm1184_vm8 = vweird.f32 %v3477_v4  ;;  %vm1205_vm10 = vmor %vm1203_vm9, %vm1204_vm7 }
 0x238   : > { %v1176_v10 = vsel %vm1175_vm4, %v3471_v55, %v1172_v5  ;;  %v1199_v11 = vmul.f32 %v3475_v2, %v1198_v6  ;;  %vm1185_vm12 = vmor %vm1183_vm11, %vm1184_vm8 }
 0x239   : > { %v1207_v13 = vmul.f32 %v1176_v10, %v1143_v34  ;;  %v1196_v14 = vsel %vm1195_vm6, %v3473_v58, %v1192_v8  ;;  %v1179_v15 = vmul.f32 %v3477_v4, %v1178_v9 }
 0x23a   : > { %v1209_v16 = vmul.f32 %v1196_v14, %v1145_v33  ;;  %v1200_v17 = vmul.f32 0.5, %v1199_v11 }
 0x23b   : > { %v1214_v18 = vmul.f32 %v3466_v7, %v1207_v13  ;;  %v1180_v19 = vmul.f32 0.5, %v1179_v15 }
 0x23c   : > { %v1216_v20 = vmul.f32 %v3466_v7, %v1209_v16  ;;  %v1201_v21 = vsub.f32 1.5, %v1200_v17 }
 0x23d   : > { %v1221_v22 = vadd.f32 %v3467_v12, %v1214_v18  ;;  %v1181_v23 = vsub.f32 1.5, %v1180_v19 }
 0x23e   : > { %v1223_v24 = vadd.f32 %v3467_v12, %v1216_v20  ;;  %v1202_v25 = vmul.f32 %v3475_v2, %v1201_v21 }
 0x23f   : > { %1225 = vst [vmem:[#allocation2 + $0x10] sm:$0xff] %v1221_v22  ;;  %v1182_v26 = vmul.f32 %v3477_v4, %v1181_v23 }
 0x240   : > { %1227 = vst [vmem:[#allocation2 + $0x18] sm:$0xff] %v1223_v24  ;;  %v1206_v27 = vsel %vm1205_vm10, %v3475_v2, %v1202_v25 }
 0x241   : > { %v1210_v28 = vmul.f32 %v1206_v27, %v4170_v41  ;;  %v1186_v29 = vsel %vm1185_vm12, %v3477_v4, %v1182_v26 }
 0x242   : > { %v1208_v30 = vmul.f32 %v1186_v29, %v4172_v42 }
 0x243   : > { %v1217_v31 = vmul.f32 %v3466_v7, %v1210_v28 }
 0x244   : > { %v1215_v32 = vmul.f32 %v3466_v7, %v1208_v30 }
 0x245   : > { %v1224_v33 = vadd.f32 %v3467_v12, %v1217_v31 }
 0x246   : > { %v1222_v34 = vadd.f32 %v3467_v12, %v1215_v32 }
 0x247   : > { %1228 = vst [vmem:[#allocation2 + $0x8] sm:$0xff] %v1224_v33 }
 0x248   : > { %1226 = vst [vmem:[#allocation2] sm:$0xff] %v1222_v34 }
 0x249 PF: > { %v3307_v35 = vld [vmem:[%s4082_s0 + $0xac] sm:$0xf]  ;;  %v3033_v36 = vld [vmem:[%s4082_s0 + $0xb4] sm:$0xf0]  ;;  %v3304_v37 = vld [vmem:[%s4082_s0 + $0x94] sm:$0xf]  ;;  %s4685_s19 = scalar_lea.vmem %s4596_s11, %s4106_s1 }
 0x24a   : > { %v3036_v38 = vor.u32 %v3307_v35, %v3033_v36  ;;  %v3021_v39 = vld [vmem:[%s4082_s0 + $0x9c] sm:$0xf0]  ;;  %v3031_v41 = vld [vmem:[%s4082_s0 + $0xa8] sm:$0xf]  ;;  %v3308_v42 = vld [vmem:[%s4082_s0 + $0xb0] sm:$0xf0] }
 0x24b   : > { %v3024_v40 = vor.u32 %v3304_v37, %v3021_v39  ;;  %v3301_v43 = vld [vmem:[%s4082_s0 + $0x7c] sm:$0xf]  ;;  %v3009_v44 = vld [vmem:[%s4082_s0 + $0x84] sm:$0xf0]  ;;  %v3032_v45 = vor.u32 %v3308_v42, %v3031_v41  ;;  %v3019_v46 = vld [vmem:[%s4082_s0 + $0x90] sm:$0xf] }
 0x24c   : > { %1426 = vmatpush.bf16.msra.mxu1 %v3036_v38  ;;  %v3305_v47 = vld [vmem:[%s4082_s0 + $0x98] sm:$0xf0]  ;;  %v3012_v49 = vor.u32 %v3301_v43, %v3009_v44  ;;  %v3007_v50 = vld [vmem:[%s4082_s0 + $0x78] sm:$0xf]  ;;  %v3302_v51 = vld [vmem:[%s4082_s0 + $0x80] sm:$0xf0] }
 0x24d   : > { %1407 = vmatpush.bf16.msra.mxu0 %v3032_v45  ;;  %v3020_v48 = vor.u32 %v3305_v47, %v3019_v46  ;;  %v3298_v52 = vld [vmem:[%s4082_s0 + $0x64] sm:$0xf]  ;;  %v2997_v53 = vld [vmem:[%s4082_s0 + $0x6c] sm:$0xf0]  ;;  %v3295_v54 = vld [vmem:[%s4082_s0 + $0x4c] sm:$0xf]  ;;  %v3008_v55 = vor.u32 %v3302_v51, %v3007_v50 }
 0x24e   : > { %v3000_v56 = vor.u32 %v3298_v52, %v2997_v53  ;;  %v2985_v57 = vld [vmem:[%s4082_s0 + $0x54] sm:$0xf0]  ;;  %v2995_v58 = vld [vmem:[%s4082_s0 + $0x60] sm:$0xf]  ;;  %v3299_v59 = vld [vmem:[%s4082_s0 + $0x68] sm:$0xf0] }
 0x24f   : > { %v2996_v60 = vor.u32 %v3299_v59, %v2995_v58  ;;  %v2988_v61 = vor.u32 %v3295_v54, %v2985_v57  ;;  %v2983_v62 = vld [vmem:[%s4082_s0 + $0x48] sm:$0xf]  ;;  %v3296_v63 = vld [vmem:[%s4082_s0 + $0x50] sm:$0xf0]  ;;  %v2973_v1 = vld [vmem:[%s4082_s0 + $0x3c] sm:$0xf0] }
 0x250   : > { %1427 = vmatpush.bf16.msra.mxu1 %v3024_v40  ;;  %v3292_v0 = vld [vmem:[%s4082_s0 + $0x34] sm:$0xf]  ;;  %v2984_v2 = vor.u32 %v3296_v63, %v2983_v62  ;;  %v2971_v4 = vld [vmem:[%s4082_s0 + $0x30] sm:$0xf]  ;;  %v3293_v5 = vld [vmem:[%s4082_s0 + $0x38] sm:$0xf0] }
 0x251   : > { %1408 = vmatpush.bf16.msra.mxu0 %v3020_v48  ;;  %v2976_v3 = vor.u32 %v3292_v0, %v2973_v1  ;;  %v3289_v6 = vld [vmem:[%s4082_s0 + $0x1c] sm:$0xf]  ;;  %v2961_v7 = vld [vmem:[%s4082_s0 + $0x24] sm:$0xf0]  ;;  %v2972_v8 = vor.u32 %v3293_v5, %v2971_v4  ;;  %v2959_v10 = vld [vmem:[%s4082_s0 + $0x18] sm:$0xf] }
 0x252   : > { %v2964_v9 = vor.u32 %v3289_v6, %v2961_v7  ;;  %v3290_v11 = vld [vmem:[%s4082_s0 + $0x20] sm:$0xf0]  ;;  %v2949_v13 = vld [vmem:[%s4082_s0 + $0xc] sm:$0xf0]  ;;  %v2947_v18 = vld [vmem:[%s4082_s0] sm:$0xf] }
 0x253   : > { %v3286_v12 = vld [vmem:[%s4082_s0 + $0x4] sm:$0xf]  ;;  %v4216_v14 = vld [vmem:[#allocation2 + $0x10] sm:$0xff]  ;;  %v2960_v15 = vor.u32 %v3290_v11, %v2959_v10  ;;  %v3287_v19 = vld [vmem:[%s4082_s0 + $0x8] sm:$0xf0]  ;;  %s4675_s13 = sld [smem:[#allocation23_spill]] }
 0x254   : > { %1428 = vmatpush.bf16.msra.mxu1 %v3012_v49  ;;  %v2952_v16 = vor.u32 %v3286_v12, %v2949_v13  ;;  %v4218_v17 = vld [vmem:[#allocation2] sm:$0xff]  ;;  %v2948_v21 = vor.u32 %v3287_v19, %v2947_v18  ;;  %v4228_v22 = vld [vmem:[#allocation2 + $0x18] sm:$0xff]  ;;  %v4230_v23 = vld [vmem:[#allocation2 + $0x8] sm:$0xff]  ;;  %s4676_s2 = sld [smem:[#allocation22_spill]]  ;;  %vm1509_vm13 = vcmask 261120   ;;  %p3205_p1 = scmp.ne.s32.totalorder %s3941_s6, 1 }
 0x255   : > { %1409 = vmatpush.bf16.msra.mxu0 %v3008_v55  ;;  %v4224_v20 = vpack.c.bf16 %v4218_v17, %v4216_v14  ;;  %v4234_v24 = vpack.c.bf16 %v4230_v23, %v4228_v22  ;;  %v4239_v30 = vld [vmem:[%s4122_s17] sm:$0x7]  ;;  %s4686_s29 = sld [smem:[#allocation31_spill]] }
 0x256   : > { %v1273_v31 = vperm.slane %v4239_v30, 0  ;;  %v1274_v32 = vperm.slane %v4239_v30, 1  ;;  %s4693_s10 = sld [smem:[#allocation40_spill]] (!%p3205_p1) }
 0x258   : > { %1429 = vmatpush.bf16.msra.mxu1 %v3000_v56 }
 0x259   : > { %1410 = vmatpush.bf16.msra.mxu0 %v2996_v60  ;;  %v1474_v35 = vld [vmem:[%s4675_s13] sm:$0x1] }
 0x25a   : > { %v1476_v39 = vpack.i.b16 %v1474_v35, %v1474_v35  ;;  %v1233_v10 = vld [vmem:[%s4676_s2] sm:$0xff] }
 0x25b   : > { %s4687_s23 = scalar_lea.vmem %s4686_s29, %s4106_s1  ;;  %s4695_s29 = sld [smem:[#allocation43_spill]] (!%p3205_p1) }
 0x25c   : > { %1430 = vmatpush.bf16.msra.mxu1 %v2988_v61  ;;  %v1478_v44 = vperm.slane %v1476_v39, 0  ;;  %v1618_v61 = vshrl.u32 %v1474_v35, 16  ;;  %v1236_v35 = vld [vmem:[%s4676_s2 + $0x18] sm:$0xff]  ;;  %v3303_v39 = vld [vmem:[%s4082_s0 + $0x88] sm:$0xf0] }
 0x25d   : > { %1411 = vmatpush.bf16.msra.mxu0 %v2984_v2 }
 0x25e   : > { %v4246_v49 = vunpack.c.l.bf16 %v1478_v44  ;;  %v1619_v0 = vpack.i.b16 %v1618_v61, %v1618_v61  ;;  %v3288_v61 = vld [vmem:[%s4082_s0 + $0x10] sm:$0xf0] }
 0x260   : > { %1431 = vmatpush.bf16.msra.mxu1 %v2976_v3  ;;  %v1621_v2 = vperm.slane %v1619_v0, 0 }
 0x261   : > { %1412 = vmatpush.bf16.msra.mxu0 %v2972_v8 }
 0x262   : > { %v4252_v3 = vunpack.c.l.bf16 %v1621_v2 }
 0x264   : > { %1432 = vmatpush.bf16.msra.mxu1 %v2964_v9 }
 0x265   : > { %1413 = vmatpush.bf16.msra.mxu0 %v2960_v15  ;;  %v1234_v15 = vld [vmem:[%s4676_s2 + $0x8] sm:$0xff] }
 0x268   : > { %1433 = vmatpush.bf16.msra.mxu1 %v2952_v16 }
 0x269   : > { %1414 = vmatpush.bf16.msra.mxu0 %v2948_v21  ;;  %v1235_v21 = vld [vmem:[%s4676_s2 + $0x10] sm:$0xff] }
 0x26b   : > { %1434 = vmatmul.bf16.vlgmr.msra.gmra.mxu1 %v4224_v20 }
 0x26c   : > { %1415 = vmatmul.bf16.vlgmr.msra.gmra.mxu0 %v4224_v20 }
 0x27b   : > { %1439 = vmatmul.bf16.gmra.mxu1 %v4234_v24 }
 0x27c   : > { %1420 = vmatmul.bf16.gmra.mxu0 %v4234_v24 }
 0x2e8   : > { %v1435_v25 = vpop.f32.mrf.mxu1 }
 0x2e9   : > { %v1416_v27 = vpop.f32.mrf.mxu0  ;;  %v1436_v46 = vadd.f32 %v1435_v25, %v1274_v32 }
 0x2ea   : > { %v1417_v37 = vadd.f32 %v1416_v27, %v1273_v31  ;;  %v3039_v27 = vld [vmem:[%s4082_s0 + $0xb0] sm:$0xf] }
 0x2ec   : > { %v1464_v42 = vpack.c.bf16 %v1417_v37, %v1417_v37 }
 0x2ee   : > { %v1479_v47 = vunpack.c.l.bf16 %v1464_v42  ;;  %v3003_v42 = vld [vmem:[%s4082_s0 + $0x68] sm:$0xf] }
 0x2f0   : > { %v1437_v26 = vpop.f32.mrf.mxu1  ;;  %v1484_v51 = vmul.f32 %v4246_v49, %v1479_v47  ;;  %v1623_v4 = vmul.f32 %v4252_v3, %v1479_v47 }
 0x2f1   : > { %v1418_v29 = vpop.f32.mrf.mxu0  ;;  %v1438_v45 = vadd.f32 %v1437_v26, %v1274_v32 }
 0x2f2   : > { %v1419_v38 = vadd.f32 %v1418_v29, %v1273_v31 }
 0x2f3   : > { %v1468_v50 = vpack.c.bf16 %v1438_v45, %v1436_v46  ;;  %v2991_v45 = vld [vmem:[%s4082_s0 + $0x50] sm:$0xf]  ;;  %v3297_v46 = vld [vmem:[%s4082_s0 + $0x58] sm:$0xf0] }
 0x2f4   : > { %v1465_v43 = vpack.c.bf16 %v1419_v38, %v1419_v38  ;;  %v3015_v38 = vld [vmem:[%s4082_s0 + $0x80] sm:$0xf] }
 0x2f6   : > { %v1480_v48 = vunpack.c.l.bf16 %v1465_v43  ;;  %v3300_v43 = vld [vmem:[%s4082_s0 + $0x70] sm:$0xf0] }
 0x2f7   : > { %v3004_v44 = vor.u32 %v3300_v43, %v3003_v42 }
 0x2f8   : > { %v1440_v28 = vpop.f32.mrf.mxu1  ;;  %v1485_v52 = vmul.f32 %v4246_v49, %v1480_v48  ;;  %v1624_v5 = vmul.f32 %v4252_v3, %v1480_v48  ;;  %v2992_v48 = vor.u32 %v3297_v46, %v2991_v45 }
 0x2f9   : > { %v1441_v34 = vadd.f32 %v1440_v28, %v1274_v32  ;;  %v1421_v41 = vpop.f32.mrf.mxu0  ;;  %v3309_v28 = vld [vmem:[%s4082_s0 + $0xb8] sm:$0xf0] }
 0x2fa   : > { %v1422_v54 = vadd.f32 %v1421_v41, %v1273_v31  ;;  %v1488_v56 = vpack.c.bf16 %v1485_v52, %v1484_v51  ;;  %v1627_v6 = vpack.c.bf16 %v1624_v5, %v1623_v4  ;;  %v3040_v29 = vor.u32 %v3309_v28, %v3039_v27  ;;  %v2979_v51 = vld [vmem:[%s4082_s0 + $0x38] sm:$0xf]  ;;  %v3294_v52 = vld [vmem:[%s4082_s0 + $0x40] sm:$0xf0] }
 0x2fc   : > { %v1466_v57 = vpack.c.bf16 %v1422_v54, %v1422_v54  ;;  %1445 = vmatpush.bf16.msra.mxu2 %v3040_v29  ;;  %v2980_v54 = vor.u32 %v3294_v52, %v2979_v51 }
 0x2fe   : > { %v1481_v59 = vunpack.c.l.bf16 %v1466_v57 }
 0x300   : > { %v1442_v33 = vpop.f32.mrf.mxu1  ;;  %v1486_v62 = vmul.f32 %v4246_v49, %v1481_v59  ;;  %v1625_v7 = vmul.f32 %v4252_v3, %v1481_v59 }
 0x301   : > { %v1443_v36 = vadd.f32 %v1442_v33, %v1274_v32  ;;  %v1423_v53 = vpop.f32.mrf.mxu0  ;;  %v3027_v32 = vld [vmem:[%s4082_s0 + $0x98] sm:$0xf]  ;;  %v3306_v33 = vld [vmem:[%s4082_s0 + $0xa0] sm:$0xf0] }
 0x302   : > { %v1424_v55 = vadd.f32 %v1423_v53, %v1273_v31 }
 0x303   : > { %v1469_v40 = vpack.c.bf16 %v1443_v36, %v1441_v34  ;;  %v3028_v34 = vor.u32 %v3306_v33, %v3027_v32 }
 0x304   : > { %v1467_v58 = vpack.c.bf16 %v1424_v55, %v1424_v55  ;;  %v2967_v55 = vld [vmem:[%s4082_s0 + $0x20] sm:$0xf] }
 0x305   : > { %1496 = vmatpush.bf16.xpose.msra.mxu3 %v1469_v40  ;;  %1446 = vmatpush.bf16.msra.mxu2 %v3028_v34 }
 0x306   : > { %v1482_v60 = vunpack.c.l.bf16 %v1467_v58 }
 0x308   : > { %v1487_v63 = vmul.f32 %v4246_v49, %v1482_v60  ;;  %v1626_v8 = vmul.f32 %v4252_v3, %v1482_v60  ;;  %v2955_v60 = vld [vmem:[%s4082_s0 + $0x8] sm:$0xf] }
 0x30a   : > { %v1489_v1 = vpack.c.bf16 %v1487_v63, %v1486_v62  ;;  %v1628_v9 = vpack.c.bf16 %v1626_v8, %v1625_v7  ;;  %v2956_v63 = vor.u32 %v3288_v61, %v2955_v60 }
 0x30d   : > { %1497 = vmatpush.bf16.xpose.msra.mxu3 %v1468_v50 }
 0x314   : > { %1498 = vmatmul.bf16.vlgmr.msra.gmra.mxu3 %v1488_v56  ;;  %v3291_v56 = vld [vmem:[%s4082_s0 + $0x28] sm:$0xf0] }
 0x315   : > { %1635 = vmatpush.bf16.xpose.msrb.mxu3 %v1469_v40  ;;  %v3016_v40 = vor.u32 %v3303_v39, %v3015_v38  ;;  %v2968_v58 = vor.u32 %v3291_v56, %v2967_v55  ;;  %v1275_v56 = vperm.slane %v4239_v30, 2 }
 0x317   : > { %1447 = vmatpush.bf16.msra.mxu2 %v3016_v40 }
 0x31b   : > { %1448 = vmatpush.bf16.msra.mxu2 %v3004_v44 }
 0x31d   : > { %1636 = vmatpush.bf16.xpose.msrb.mxu3 %v1468_v50 }
 0x31f   : > { %1449 = vmatpush.bf16.msra.mxu2 %v2992_v48 }
 0x323   : > { %1450 = vmatpush.bf16.msra.mxu2 %v2980_v54 }
 0x324   : > { %1503 = vmatmul.bf16.gmra.mxu3 %v1489_v1 }
 0x327   : > { %1451 = vmatpush.bf16.msra.mxu2 %v2968_v58 }
 0x32b   : > { %1452 = vmatpush.bf16.msra.mxu2 %v2956_v63 }
 0x32e   : > { %1453 = vmatmul.bf16.vlgmr.msra.gmra.mxu2 %v4224_v20 }
 0x334   : > { %1637 = vmatmul.bf16.vlgmr.msrb.gmra.mxu3 %v1627_v6 }
 0x33e   : > { %1458 = vmatmul.bf16.gmra.mxu2 %v4234_v24 }
 0x344   : > { %1642 = vmatmul.bf16.gmra.mxu3 %v1628_v9 }
 0x397   : > { %v1499_v11 = vpop.f32.mrf.mxu3 }
 0x398   : > { %v4261_v12 = vadd.f32 %v1499_v11, %v1233_v10 }
 0x39a   : > { %v1510_v13 = vsel %vm1509_vm13, %v4261_v12, -inf }
 0x39b   : > { %1511 = vmax.xlane.f32.xlu0 %v1510_v13 }
 0x39f   : > { %v1501_v16 = vpop.f32.mrf.mxu3 }
 0x3a0   : > { %v4268_v18 = vadd.f32 %v1501_v16, %v1234_v15 }
 0x3a2   : > { %v1513_v19 = vsel %vm1509_vm13, %v4268_v18, -inf }
 0x3a3   : > { %1514 = vmax.xlane.f32.xlu0 %v1513_v19 }
 0x3a7   : > { %v1504_v25 = vpop.f32.mrf.mxu3 }
 0x3a8   : > { %v4275_v26 = vadd.f32 %v1504_v25, %v1235_v21 }
 0x3aa   : > { %v1516_v31 = vsel %vm1509_vm13, %v4275_v26, -inf }
 0x3ab   : > { %1517 = vmax.xlane.f32.xlu2 %v1516_v31 }
 0x3af   : > { %v1506_v36 = vpop.f32.mrf.mxu3 }
 0x3b0   : > { %v4286_v37 = vadd.f32 %v1506_v36, %v1236_v35 }
 0x3b1   : > { %v1454_v52 = vpop.f32.mrf.mxu2 }
 0x3b2   : > { %v1519_v41 = vsel %vm1509_vm13, %v4286_v37, -inf  ;;  %v1455_v60 = vadd.f32 %v1454_v52, %v1275_v56 }
 0x3b3   : > { %1520 = vmax.xlane.f32.xlu2 %v1519_v41 }
 0x3b7   : > { %v1638_v47 = vpop.f32.mrf.mxu3 }
 0x3b8   : > { %v1639_v50 = vadd.f32 %v1638_v47, %v1233_v10 }
 0x3b9   : > { %v1456_v54 = vpop.f32.mrf.mxu2 }
 0x3ba   : > { %v1648_v53 = vsel %vm1509_vm13, %v1639_v50, -inf  ;;  %v1457_v61 = vadd.f32 %v1456_v54, %v1275_v56 }
 0x3bb   : > { %1649 = vmax.xlane.f32.xlu1 %v1648_v53 }
 0x3bf   : > { %v1640_v57 = vpop.f32.mrf.mxu3 }
 0x3c0   : > { %v1641_v59 = vadd.f32 %v1640_v57, %v1234_v15 }
 0x3c1   : > { %v1459_v55 = vpop.f32.mrf.mxu2 }
 0x3c2   : > { %v1651_v62 = vsel %vm1509_vm13, %v1641_v59, -inf  ;;  %v1460_v58 = vadd.f32 %v1459_v55, %v1275_v56 }
 0x3c3   : > { %1652 = vmax.xlane.f32.xlu1 %v1651_v62 }
 0x3c4   : > { %v1472_v62 = vpack.c.bf16 %v1460_v58, %v1460_v58 }
 0x3c7   : > { %v1643_v0 = vpop.f32.mrf.mxu3 }
 0x3c8   : > { %v1644_v1 = vadd.f32 %v1643_v0, %v1235_v21  ;;  %v1470_v0 = vpack.c.bf16 %v1455_v60, %v1455_v60 }
 0x3c9   : > { %v1461_v57 = vpop.f32.mrf.mxu2 }
 0x3ca   : > { %v1654_v2 = vsel %vm1509_vm13, %v1644_v1, -inf }
 0x3cb   : > { %1655 = vmax.xlane.f32.xlu0 %v1654_v2  ;;  %v1610_v2 = vunpack.c.l.bf16 %v1472_v62 }
 0x3cf   : > { %v1645_v4 = vpop.f32.mrf.mxu3 }
 0x3d0   : > { %v1646_v5 = vadd.f32 %v1645_v4, %v1236_v35 }
 0x3d2   : > { %v1657_v6 = vsel %vm1509_vm13, %v1646_v5, -inf }
 0x3d3   : > { %1658 = vmax.xlane.f32.xlu1 %v1657_v6 }
 0x40e   : > { %v1512_v7 = vpop.xlane.xlu0 %1511 }
 0x40f   : > { %v1522_v8 = vsub.f32 %v4261_v12, %v1512_v7  ;;  %v1748_v7 = vmul.f32 %v4252_v3, %v1610_v2 }
 0x411   : > { %v1526_v9 = vmul.f32 1.442695, %v1522_v8 }
 0x413   : > { %3484 = vpow2.f32 %v1526_v9  ;;  %v1614_v9 = vmul.f32 %v1610_v2, %v4246_v49 }
 0x416   : > { %v1515_v10 = vpop.xlane.xlu0 %1514 }
 0x417   : > { %v1523_v11 = vsub.f32 %v4268_v18, %v1515_v10 }
 0x419   : > { %v4310_v13 = vpop.eup %3484  ;;  %v1528_v15 = vmul.f32 1.442695, %v1523_v11 }
 0x41a   : > { %v1534_v20 = vsel %vm1509_vm13, %v4310_v13, 0.0 }
 0x41b   : > { %3486 = vpow2.f32 %v1528_v15  ;;  %1535 = vadd.xlane.f32.xlu2 %v1534_v20 }
 0x41e   : > { %v1518_v16 = vpop.xlane.xlu2 %1517 }
 0x41f   : > { %v1524_v19 = vsub.f32 %v4275_v26, %v1518_v16 }
 0x421   : > { %v4315_v24 = vpop.eup %3486  ;;  %v1530_v21 = vmul.f32 1.442695, %v1524_v19 }
 0x422   : > { %v1537_v12 = vsel %vm1509_vm13, %v4315_v24, 0.0 }
 0x423   : > { %3488 = vpow2.f32 %v1530_v21  ;;  %1538 = vadd.xlane.f32.xlu0 %v1537_v12 }
 0x426   : > { %v1521_v27 = vpop.xlane.xlu2 %1520 }
 0x427   : > { %v1525_v31 = vsub.f32 %v4286_v37, %v1521_v27 }
 0x429   : > { %v4319_v18 = vpop.eup %3488  ;;  %v1532_v32 = vmul.f32 1.442695, %v1525_v31 }
 0x42a   : > { %v1540_v25 = vsel %vm1509_vm13, %v4319_v18, 0.0 }
 0x42b   : > { %1541 = vadd.xlane.f32.xlu0 %v1540_v25 }
 0x42e   : > { %v1650_v28 = vpop.xlane.xlu1 %1649 }
 0x42f   : > { %v1660_v29 = vsub.f32 %v1639_v50, %v1650_v28 }
 0x431   : > { %v1664_v26 = vmul.f32 1.442695, %v1660_v29 }
 0x433   : > { %3490 = vpow2.f32 %v1664_v26 }
 0x434   : > { %3492 = vpow2.f32 %v1532_v32 }
 0x436   : > { %v1653_v33 = vpop.xlane.xlu1 %1652 }
 0x437   : > { %v1661_v34 = vsub.f32 %v1641_v59, %v1653_v33  ;;  %v1462_v59 = vadd.f32 %v1461_v57, %v1275_v56 }
 0x439   : > { %v4324_v35 = vpop.eup %3490  ;;  %v1666_v36 = vmul.f32 1.442695, %v1661_v34  ;;  %v1473_v63 = vpack.c.bf16 %v1462_v59, %v1462_v59 }
 0x43a   : > { %v1672_v38 = vsel %vm1509_vm13, %v4324_v35, 0.0  ;;  %v4328_v40 = vpop.eup %3492 }
 0x43b   : > { %3494 = vpow2.f32 %v1666_v36  ;;  %1673 = vadd.xlane.f32.xlu1 %v1672_v38  ;;  %v1543_v43 = vsel %vm1509_vm13, %v4328_v40, 0.0  ;;  %v1611_v4 = vunpack.c.l.bf16 %v1473_v63 }
 0x43d   : > { %v1749_v8 = vmul.f32 %v4252_v3, %v1611_v4  ;;  %v1615_v30 = vmul.f32 %v1611_v4, %v4246_v49 }
 0x43e   : > { %v1656_v39 = vpop.xlane.xlu0 %1655 }
 0x43f   : > { %v1662_v41 = vsub.f32 %v1644_v1, %v1656_v39  ;;  %v1471_v1 = vpack.c.bf16 %v1457_v61, %v1457_v61  ;;  %v1751_v16 = vpack.c.bf16 %v1749_v8, %v1748_v7  ;;  %v1617_v19 = vpack.c.bf16 %v1615_v30, %v1614_v9 }
 0x441   : > { %v4330_v42 = vpop.eup %3494  ;;  %v1668_v37 = vmul.f32 1.442695, %v1662_v41  ;;  %v1609_v6 = vunpack.c.l.bf16 %v1471_v1  ;;  %1764 = vmatpush.bf16.msrb.mxu0 %v1751_v16  ;;  %1789 = vmatpush.bf16.msrb.mxu1 %v1617_v19 }
 0x442   : > { %v1675_v44 = vsel %vm1509_vm13, %v4330_v42, 0.0 }
 0x443   : > { %3496 = vpow2.f32 %v1668_v37  ;;  %1544 = vadd.xlane.f32.xlu1 %v1543_v43  ;;  %1676 = vadd.xlane.f32.xlu2 %v1675_v44  ;;  %v1747_v11 = vmul.f32 %v4252_v3, %v1609_v6  ;;  %v1613_v20 = vmul.f32 %v1609_v6, %v4246_v49 }
 0x446   : > { %v1659_v45 = vpop.xlane.xlu1 %1658 }
 0x447   : > { %v1663_v46 = vsub.f32 %v1646_v5, %v1659_v45  ;;  %v1608_v5 = vunpack.c.l.bf16 %v1470_v0 }
 0x449   : > { %v4336_v47 = vpop.eup %3496  ;;  %v1670_v48 = vmul.f32 1.442695, %v1663_v46  ;;  %v1746_v10 = vmul.f32 %v4252_v3, %v1608_v5  ;;  %v1612_v15 = vmul.f32 %v1608_v5, %v4246_v49 }
 0x44a   : > { %v1678_v50 = vsel %vm1509_vm13, %v4336_v47, 0.0 }
 0x44b   : > { %3498 = vpow2.f32 %v1670_v48  ;;  %1679 = vadd.xlane.f32.xlu2 %v1678_v50  ;;  %v1750_v21 = vpack.c.bf16 %v1747_v11, %v1746_v10  ;;  %v1616_v12 = vpack.c.bf16 %v1613_v20, %v1612_v15 }
 0x44d   : > { %1765 = vmatpush.bf16.msrb.mxu0 %v1750_v21  ;;  %1790 = vmatpush.bf16.msrb.mxu1 %v1616_v12 }
 0x451   : > { %v4340_v51 = vpop.eup %3498 }
 0x452   : > { %v1681_v53 = vsel %vm1509_vm13, %v4340_v51, 0.0 }
 0x453   : > { %1682 = vadd.xlane.f32.xlu0 %v1681_v53 }
 0x48e   : > { %v1536_v25 = vpop.xlane.xlu2 %1535 }
 0x48f   : > { %3500 = vrcp.f32 %v1536_v25  ;;  %v1557_v33 = vand.u32 2147483648, %v1536_v25  ;;  %vm1551_vm15 = vweird.f32 %v1536_v25  ;;  %v1555_v34 = vand.u32 2147483647, %v1536_v25 }
 0x491   : > { %v1558_v43 = vor.u32 1.1754944e-38, %v1557_v33  ;;  %vm1556_vm2 = vcmp.eq.f32.partialorder %v1555_v34, 8.507059e+37 }
 0x495   : > { %v3501_v27 = vpop.eup %3500 }
 0x496   : > { %v1547_v28 = vmul.f32 %v3501_v27, %v1536_v25  ;;  %v1539_v29 = vpop.xlane.xlu0 %1538  ;;  %vm1552_vm14 = vweird.f32 %v3501_v27 }
 0x497   : > { %3502 = vrcp.f32 %v1539_v29  ;;  %vm1553_vm0 = vmor %vm1551_vm15, %vm1552_vm14  ;;  %v1572_v38 = vand.u32 2147483648, %v1539_v29  ;;  %v1570_v37 = vand.u32 2147483647, %v1539_v29  ;;  %vm1566_vm3 = vweird.f32 %v1539_v29 }
 0x498   : > { %v1548_v31 = vsub.f32 1.0, %v1547_v28 }
 0x499   : > { %v1573_v46 = vor.u32 1.1754944e-38, %v1572_v38  ;;  %vm1571_vm5 = vcmp.eq.f32.partialorder %v1570_v37, 8.507059e+37  ;;  %v3478_v38 = vld [vmem:[%s4685_s19] ss:$0 sm:$0xff]  ;;  %s4694_s19 = sld [smem:[#allocation42_spill]] (!%p3205_p1) }
 0x49a   : > { %v1549_v3 = vmul.f32 %v3501_v27, %v1548_v31 }
 0x49c   : > { %v1550_v32 = vadd.f32 %v3501_v27, %v1549_v3 }
 0x49d   : > { %v3503_v26 = vpop.eup %3502 }
 0x49e   : > { %v1562_v49 = vmul.f32 %v3503_v26, %v1539_v29  ;;  %v1554_v39 = vsel %vm1553_vm0, %v3501_v27, %v1550_v32  ;;  %vm1567_vm1 = vweird.f32 %v3503_v26  ;;  %v1542_v45 = vpop.xlane.xlu0 %1541 }
 0x49f   : > { %vm1568_vm4 = vmor %vm1566_vm3, %vm1567_vm1  ;;  %v1559_v48 = vsel %vm1556_vm2, %v1558_v43, %v1554_v39  ;;  %3504 = vrcp.f32 %v1542_v45  ;;  %v1585_v2 = vand.u32 2147483647, %v1542_v45  ;;  %vm1581_vm7 = vweird.f32 %v1542_v45 }
 0x4a0   : > { %v1563_v36 = vsub.f32 1.0, %v1562_v49  ;;  %v1560_v53 = vmul.f32 %v4310_v13, %v1559_v48 }
 0x4a1   : > { %vm4356_vm8 = vcmp.eq.f32.partialorder %v1585_v2, 8.507059e+37 }
 0x4a2   : > { %v1564_v41 = vmul.f32 %v3503_v26, %v1563_v36 }
 0x4a4   : > { %v1565_v44 = vadd.f32 %v3503_v26, %v1564_v41 }
 0x4a5   : > { %v3505_v56 = vpop.eup %3504 }
 0x4a6   : > { %v1569_v50 = vsel %vm1568_vm4, %v3503_v26, %v1565_v44  ;;  %v1577_v58 = vmul.f32 %v3505_v56, %v1542_v45  ;;  %vm1582_vm6 = vweird.f32 %v3505_v56 }
 0x4a7   : > { %v1574_v52 = vsel %vm1571_vm5, %v1573_v46, %v1569_v50  ;;  %vm4362_vm9 = vmor %vm1581_vm7, %vm1582_vm6 }
 0x4a8   : > { %v1575_v54 = vmul.f32 %v4315_v24, %v1574_v52  ;;  %v1578_v59 = vsub.f32 1.0, %v1577_v58  ;;  %v1587_v24 = vand.u32 2147483648, %v1542_v45 }
 0x4aa   : > { %v1606_v55 = vpack.c.bf16 %v1575_v54, %v1560_v53  ;;  %v1579_v0 = vmul.f32 %v3505_v56, %v1578_v59  ;;  %v1588_v15 = vor.u32 1.1754944e-38, %v1587_v24 }
 0x4ac   : > { %3043 = vmatmul.msk.bf16.vlgmr.msrb.gmra.mxu1 %vm1509_vm13, %v1606_v55  ;;  %v1580_v4 = vadd.f32 %v3505_v56, %v1579_v0 }
 0x4ae   : > { %v1674_v57 = vpop.xlane.xlu1 %1673  ;;  %v1584_v19 = vsel %vm4362_vm9, %v3505_v56, %v1580_v4 }
 0x4af   : > { %3506 = vrcp.f32 %v1674_v57  ;;  %v1695_v20 = vand.u32 2147483648, %v1674_v57  ;;  %vm1689_vm11 = vweird.f32 %v1674_v57  ;;  %v1693_v21 = vand.u32 2147483647, %v1674_v57 }
 0x4b0   : > { %v1589_v34 = vsel %vm4356_vm8, %v1588_v15, %v1584_v19  ;;  %v3315_v15 = vld [vmem:[%s4113_s18 + $0x28] sm:$0xff]  ;;  %v3312_v19 = vld [vmem:[%s4113_s18 + $0x10] sm:$0xff] }
 0x4b1   : > { %v1696_v49 = vor.u32 1.1754944e-38, %v1695_v20  ;;  %vm1694_vm1 = vcmp.eq.f32.partialorder %v1693_v21, 8.507059e+37  ;;  %v1590_v56 = vmul.f32 %v4319_v18, %v1589_v34  ;;  %v3314_v20 = vld [vmem:[%s4113_s18 + $0x20] sm:$0xff] }
 0x4b2   : > { %v3310_v21 = vld [vmem:[%s4113_s18] sm:$0xff] }
 0x4b5   : > { %v3507_v60 = vpop.eup %3506 }
 0x4b6   : > { %v1685_v61 = vmul.f32 %v3507_v60, %v1674_v57  ;;  %v1545_v62 = vpop.xlane.xlu1 %1544  ;;  %v1677_v63 = vpop.xlane.xlu2 %1676  ;;  %vm1690_vm10 = vweird.f32 %v3507_v60 }
 0x4b7   : > { %3508 = vrcp.f32 %v1545_v62  ;;  %v1602_v12 = vand.u32 2147483648, %v1545_v62  ;;  %vm4369_vm12 = vmor %vm1689_vm11, %vm1690_vm10  ;;  %v1600_v29 = vand.u32 2147483647, %v1545_v62  ;;  %v1710_v31 = vand.u32 2147483648, %v1677_v63 }
 0x4b8   : > { %v1686_v1 = vsub.f32 1.0, %v1685_v61  ;;  %3510 = vrcp.f32 %v1677_v63  ;;  %v1708_v32 = vand.u32 2147483647, %v1677_v63  ;;  %vm1596_vm0 = vweird.f32 %v1545_v62 }
 0x4b9   : > { %v1603_v39 = vor.u32 1.1754944e-38, %v1602_v12  ;;  %vm1704_vm3 = vweird.f32 %v1677_v63  ;;  %v1711_v37 = vor.u32 1.1754944e-38, %v1710_v31  ;;  %vm1601_vm5 = vcmp.eq.f32.partialorder %v1600_v29, 8.507059e+37 }
 0x4ba   : > { %v1687_v13 = vmul.f32 %v3507_v60, %v1686_v1  ;;  %vm1709_vm6 = vcmp.eq.f32.partialorder %v1708_v32, 8.507059e+37 }
 0x4bc   : > { %v1688_v10 = vadd.f32 %v3507_v60, %v1687_v13 }
 0x4bd   : > { %v3509_v5 = vpop.eup %3508 }
 0x4be   : > { %v3511_v6 = vpop.eup %3510  ;;  %v1592_v8 = vmul.f32 %v3509_v5, %v1545_v62  ;;  %v4360_v9 = vpop.xlane.xlu2 %1679  ;;  %vm1597_vm14 = vweird.f32 %v3509_v5  ;;  %v1692_v3 = vsel %vm4369_vm12, %v3507_v60, %v1688_v10  ;;  %v3317_v10 = vld [vmem:[%s4113_s18 + $0x38] sm:$0xff] }
 0x4bf   : > { %v1700_v11 = vmul.f32 %v3511_v6, %v1677_v63  ;;  %3512 = vrcp.f32 %v4360_v9  ;;  %vm1705_vm15 = vweird.f32 %v3511_v6  ;;  %vm4377_vm2 = vmor %vm1596_vm0, %vm1597_vm14  ;;  %v1697_v45 = vsel %vm1694_vm1, %v1696_v49, %v1692_v3  ;;  %1872 = vmatpush.bf16.msrb.mxu2 %v3317_v10  ;;  %v3127_v10 = vld [vmem:[%s4088_s12 + $0x60] sm:$0xf] }
 0x4c0   : > { %v1593_v16 = vsub.f32 1.0, %v1592_v8  ;;  %vm1706_vm4 = vmor %vm1704_vm3, %vm1705_vm15  ;;  %v1698_v54 = vmul.f32 %v4324_v35, %v1697_v45  ;;  %v1725_v0 = vand.u32 2147483648, %v4360_v9  ;;  %vm1719_vm8 = vweird.f32 %v4360_v9 }
 0x4c1   : > { %v1701_v25 = vsub.f32 1.0, %v1700_v11  ;;  %v1723_v35 = vand.u32 2147483647, %v4360_v9  ;;  %v3316_v11 = vld [vmem:[%s4113_s18 + $0x30] sm:$0xff] }
 0x4c2   : > { %v1594_v28 = vmul.f32 %v3509_v5, %v1593_v16  ;;  %v1726_v13 = vor.u32 1.1754944e-38, %v1725_v0  ;;  %v3313_v16 = vld [vmem:[%s4113_s18 + $0x18] sm:$0xff] }
 0x4c3   : > { %v1702_v26 = vmul.f32 %v3511_v6, %v1701_v25  ;;  %vm1724_vm11 = vcmp.eq.f32.partialorder %v1723_v35, 8.507059e+37  ;;  %1873 = vmatpush.bf16.msrb.mxu2 %v3316_v11  ;;  %v3331_v11 = vld [vmem:[%s4088_s12 + $0x64] sm:$0xf0] }
 0x4c4   : > { %v1595_v33 = vadd.f32 %v3509_v5, %v1594_v28 }
 0x4c5   : > { %v3513_v36 = vpop.eup %3512  ;;  %v1703_v41 = vadd.f32 %v3511_v6, %v1702_v26 }
 0x4c6   : > { %v1715_v43 = vmul.f32 %v3513_v36, %v4360_v9  ;;  %v1683_v44 = vpop.xlane.xlu0 %1682  ;;  %v1599_v46 = vsel %vm4377_vm2, %v3509_v5, %v1595_v33  ;;  %vm1720_vm7 = vweird.f32 %v3513_v36 }
 0x4c7   : > { %v1707_v48 = vsel %vm1706_vm4, %v3511_v6, %v1703_v41  ;;  %3514 = vrcp.f32 %v1683_v44  ;;  %v1604_v53 = vsel %vm1601_vm5, %v1603_v39, %v1599_v46  ;;  %vm1721_vm9 = vmor %vm1719_vm8, %vm1720_vm7  ;;  %v1738_v1 = vand.u32 2147483647, %v1683_v44  ;;  %1874 = vmatpush.bf16.msrb.mxu2 %v3315_v15  ;;  %v3330_v15 = vld [vmem:[%s4088_s12 + $0x64] sm:$0xf] }
 0x4c8   : > { %v1716_v50 = vsub.f32 1.0, %v1715_v43  ;;  %v1712_v52 = vsel %vm1709_vm6, %v1711_v37, %v1707_v48  ;;  %v1605_v57 = vmul.f32 %v4328_v40, %v1604_v53  ;;  %v1740_v40 = vand.u32 2147483648, %v1683_v44 }
 0x4c9   : > { %v1713_v55 = vmul.f32 %v4330_v42, %v1712_v52  ;;  %vm1734_vm12 = vweird.f32 %v1683_v44  ;;  %vm1739_vm15 = vcmp.eq.f32.partialorder %v1738_v1, 8.507059e+37 }
 0x4ca   : > { %v1717_v58 = vmul.f32 %v3513_v36, %v1716_v50  ;;  %v1607_v60 = vpack.c.bf16 %v1605_v57, %v1590_v56  ;;  %v1741_v24 = vor.u32 1.1754944e-38, %v1740_v40 }
 0x4cb   : > { %v1744_v59 = vpack.c.bf16 %v1713_v55, %v1698_v54  ;;  %1875 = vmatpush.bf16.msrb.mxu2 %v3314_v20  ;;  %v3796_v55 = vmov 128.0   ;;  %v3128_v20 = vor.u32 %v3331_v11, %v3127_v10 }
 0x4cc   : > { %3044 = vmatmul.msk.bf16.gmra.mxu1 %vm1509_vm13, %v1607_v60  ;;  %v1718_v62 = vadd.f32 %v3513_v36, %v1717_v58  ;;  %3516 = vrcp.f32 %v3796_v55 }
 0x4cd   : > { %v3515_v61 = vpop.eup %3514  ;;  %3041 = vmatmul.msk.bf16.vlgmr.msrb.gmra.mxu0 %vm1509_vm13, %v1744_v59 }
 0x4ce   : > { %v1730_v63 = vmul.f32 %v3515_v61, %v1683_v44  ;;  %vm1735_vm10 = vweird.f32 %v3515_v61  ;;  %v1722_v2 = vsel %vm1721_vm9, %v3513_v36, %v1718_v62 }
 0x4cf   : > { %vm1736_vm14 = vmor %vm1734_vm12, %vm1735_vm10  ;;  %v1727_v5 = vsel %vm1724_vm11, %v1726_v13, %v1722_v2  ;;  %1876 = vmatpush.bf16.msrb.mxu2 %v3313_v16  ;;  %v3129_v16 = vld [vmem:[%s4088_s12 + $0x68] sm:$0xf0] }
 0x4d0   : > { %v1731_v18 = vsub.f32 1.0, %v1730_v63  ;;  %v1728_v8 = vmul.f32 %v4336_v47, %v1727_v5  ;;  %v3311_v47 = vld [vmem:[%s4113_s18 + $0x8] sm:$0xff]  ;;  %v3135_v5 = vld [vmem:[%s4088_s12 + $0x70] sm:$0xf] }
 0x4d2   : > { %v1732_v42 = vmul.f32 %v3515_v61, %v1731_v18  ;;  %v3517_v56 = vpop.eup %3516 }
 0x4d3   : > { %1877 = vmatpush.bf16.msrb.mxu2 %v3312_v19  ;;  %vm1910_vm0 = vweird.f32 %v3517_v56  ;;  %v3132_v19 = vor.u32 %v3330_v15, %v3129_v16 }
 0x4d4   : > { %v1733_v4 = vadd.f32 %v3515_v61, %v1732_v42 }
 0x4d6   : > { %v1737_v6 = vsel %vm1736_vm14, %v3515_v61, %v1733_v4 }
 0x4d7   : > { %v1742_v7 = vsel %vm1739_vm15, %v1741_v24, %v1737_v6  ;;  %1878 = vmatpush.bf16.msrb.mxu2 %v3311_v47  ;;  %v3333_v6 = vld [vmem:[%s4088_s12 + $0x74] sm:$0xf0]  ;;  %v3119_v47 = vld [vmem:[%s4088_s12 + $0x50] sm:$0xf] }
 0x4d8   : > { %v1743_v9 = vmul.f32 %v4340_v51, %v1742_v7  ;;  %v3332_v7 = vld [vmem:[%s4088_s12 + $0x74] sm:$0xf] }
 0x4da   : > { %v1745_v30 = vpack.c.bf16 %v1743_v9, %v1728_v8  ;;  %v3136_v8 = vor.u32 %v3333_v6, %v3135_v5  ;;  %v3137_v9 = vld [vmem:[%s4088_s12 + $0x78] sm:$0xf0] }
 0x4db   : > { %1879 = vmatpush.bf16.msrb.mxu2 %v3310_v21  ;;  %v3329_v21 = vld [vmem:[%s4088_s12 + $0x54] sm:$0xf0] }
 0x4dc   : > { %2102 = vmatpush.bf16.msra.mxu3 %v3136_v8 }
 0x4dd   : > { %3042 = vmatmul.msk.bf16.gmra.mxu0 %vm1509_vm13, %v1745_v30  ;;  %v3140_v30 = vor.u32 %v3332_v7, %v3137_v9 }
 0x4df   : > { %2121 = vmatpush.bf16.msra.mxu0 %v3140_v30 }
 0x4e0   : > { %2103 = vmatpush.bf16.msra.mxu3 %v3128_v20 }
 0x4e3   : > { %2122 = vmatpush.bf16.msra.mxu0 %v3132_v19 }
 0x529   : > { %v1792_v51 = vpop.f32.mrf.mxu1 }
 0x531   : > { %v1794_v25 = vpop.f32.mrf.mxu1 }
 0x549   : > { %v1797_v3 = vpop.f32.mrf.mxu1 }
 0x54a   : > { %v1767_v12 = vpop.f32.mrf.mxu0 }
 0x54b   : > { %v1793_v28 = vadd.f32 %v1792_v51, %v1767_v12  ;;  %v3328_v51 = vld [vmem:[%s4088_s12 + $0x54] sm:$0xf]  ;;  %v3120_v12 = vor.u32 %v3329_v21, %v3119_v47 }
 0x54d   : > { %2104 = vmatpush.bf16.msra.mxu3 %v3120_v12  ;;  %v3479_v12 = vld [vmem:[%s4687_s23] ss:$0 sm:$0xff] }
 0x551   : > { %v1799_v32 = vpop.f32.mrf.mxu1 }
 0x552   : > { %v1769_v27 = vpop.f32.mrf.mxu0 }
 0x553   : > { %v1795_v29 = vadd.f32 %v1794_v25, %v1769_v27  ;;  %v3121_v25 = vld [vmem:[%s4088_s12 + $0x58] sm:$0xf0] }
 0x554   : > { %v3124_v27 = vor.u32 %v3328_v51, %v3121_v25 }
 0x555   : > { %v1818_v31 = vpack.c.bf16 %v1795_v29, %v1793_v28  ;;  %v3111_v28 = vld [vmem:[%s4088_s12 + $0x40] sm:$0xf]  ;;  %v3327_v29 = vld [vmem:[%s4088_s12 + $0x44] sm:$0xf0] }
 0x556   : > { %2123 = vmatpush.bf16.msra.mxu0 %v3124_v27 }
 0x557   : > { %1880 = vmatmul.bf16.vlgmr.msrb.gmra.mxu2 %v1818_v31  ;;  %v3326_v31 = vld [vmem:[%s4088_s12 + $0x44] sm:$0xf] }
 0x55a   : > { %v1772_v26 = vpop.f32.mrf.mxu0 }
 0x55b   : > { %v1798_v33 = vadd.f32 %v1797_v3, %v1772_v26  ;;  %v3112_v3 = vor.u32 %v3327_v29, %v3111_v28  ;;  %v3113_v26 = vld [vmem:[%s4088_s12 + $0x48] sm:$0xf0] }
 0x55d   : > { %2105 = vmatpush.bf16.msra.mxu3 %v3112_v3 }
 0x562   : > { %v1774_v49 = vpop.f32.mrf.mxu0 }
 0x563   : > { %v1800_v34 = vadd.f32 %v1799_v32, %v1774_v49  ;;  %v3116_v32 = vor.u32 %v3326_v31, %v3113_v26  ;;  %v3103_v49 = vld [vmem:[%s4088_s12 + $0x30] sm:$0xf] }
 0x565   : > { %v1819_v36 = vpack.c.bf16 %v1800_v34, %v1798_v33  ;;  %2124 = vmatpush.bf16.msra.mxu0 %v3116_v32  ;;  %v3325_v33 = vld [vmem:[%s4088_s12 + $0x34] sm:$0xf0]  ;;  %v3324_v34 = vld [vmem:[%s4088_s12 + $0x34] sm:$0xf] }
 0x567   : > { %1885 = vmatmul.bf16.gmra.mxu2 %v1819_v36  ;;  %v3104_v36 = vor.u32 %v3325_v33, %v3103_v49 }
 0x569   : > { %2106 = vmatpush.bf16.msra.mxu3 %v3104_v36 }
 0x5da   : > { %v1881_v39 = vpop.f32.mrf.mxu2 }
 0x5db   : > { %v1882_v41 = vadd.f32 %v3478_v38, %v1881_v39 }
 0x5dd   : > { %v1891_v37 = vadd.f32 %v1882_v41, %v4216_v14  ;;  %v1906_v14 = vmul.f32 128.0, %v3517_v56  ;;  %v3095_v41 = vld [vmem:[%s4088_s12 + $0x20] sm:$0xf] }
 0x5df   : > { %1897 = vadd.xlane.f32.xlu1 %v1891_v37  ;;  %v1907_v57 = vsub.f32 1.0, %v1906_v14 }
 0x5e1   : > { %v1908_v58 = vmul.f32 %v3517_v56, %v1907_v57  ;;  %v3079_v57 = vld [vmem:[%s4088_s12] sm:$0xf] }
 0x5e2   : > { %v1883_v43 = vpop.f32.mrf.mxu2 }
 0x5e3   : > { %v1884_v44 = vadd.f32 %v3478_v38, %v1883_v43  ;;  %v1909_v59 = vadd.f32 %v3517_v56, %v1908_v58  ;;  %v3322_v43 = vld [vmem:[%s4088_s12 + $0x24] sm:$0xf]  ;;  %v3319_v58 = vld [vmem:[%s4088_s12 + $0x4] sm:$0xf0] }
 0x5e5   : > { %v1892_v45 = vadd.f32 %v1884_v44, %v4218_v17  ;;  %v4413_v17 = vsel %vm1910_vm0, %v3517_v56, %v1909_v59  ;;  %v3318_v59 = vld [vmem:[%s4088_s12 + $0x4] sm:$0xf] }
 0x5e7   : > { %1899 = vadd.xlane.f32.xlu2 %v1892_v45 }
 0x5ea   : > { %v1886_v46 = vpop.f32.mrf.mxu2 }
 0x5eb   : > { %v1887_v48 = vadd.f32 %v3478_v38, %v1886_v46 }
 0x5ed   : > { %v1893_v50 = vadd.f32 %v1887_v48, %v4228_v22  ;;  %v3087_v48 = vld [vmem:[%s4088_s12 + $0x10] sm:$0xf] }
 0x5ef   : > { %1901 = vadd.xlane.f32.xlu0 %v1893_v50 }
 0x5f2   : > { %v1888_v52 = vpop.f32.mrf.mxu2 }
 0x5f3   : > { %v1889_v53 = vadd.f32 %v3478_v38, %v1888_v52  ;;  %v3105_v38 = vld [vmem:[%s4088_s12 + $0x38] sm:$0xf0]  ;;  %v3320_v52 = vld [vmem:[%s4088_s12 + $0x14] sm:$0xf] }
 0x5f4   : > { %v3108_v39 = vor.u32 %v3324_v34, %v3105_v38 }
 0x5f5   : > { %v1894_v54 = vadd.f32 %v1889_v53, %v4230_v23 }
 0x5f6   : > { %2125 = vmatpush.bf16.msra.mxu0 %v3108_v39 }
 0x5f7   : > { %1903 = vadd.xlane.f32.xlu1 %v1894_v54 }
 0x652   : > { %v1898_v60 = vpop.xlane.xlu1 %1897 }
 0x653   : > { %v1912_v61 = vmul.f32 %v4413_v17, %v1898_v60 }
 0x655   : > { %v4416_v22 = vsub.f32 %v1891_v37, %v1912_v61  ;;  %v3323_v37 = vld [vmem:[%s4088_s12 + $0x24] sm:$0xf0]  ;;  %v3080_v61 = vor.u32 %v3319_v58, %v3079_v57  ;;  %v3340_v58 = vld [vmem:[%s4090_s15 + $0x30] sm:$0xff] }
 0x656   : > { %v3096_v44 = vor.u32 %v3323_v37, %v3095_v41  ;;  %v3347_v57 = vld [vmem:[%s4090_s15 + $0x68] sm:$0xff] }
 0x657   : > { %v1920_v62 = vmul.f32 %v4416_v22, %v4416_v22 }
 0x658   : > { %2107 = vmatpush.bf16.msra.mxu3 %v3096_v44 }
 0x659   : > { %1924 = vadd.xlane.f32.xlu2 %v1920_v62  ;;  %v3081_v62 = vld [vmem:[%s4088_s12 + $0x8] sm:$0xf0] }
 0x65a   : > { %v1900_v23 = vpop.xlane.xlu2 %1899 }
 0x65b   : > { %v1913_v63 = vmul.f32 %v4413_v17, %v1900_v23  ;;  %v3084_v23 = vor.u32 %v3318_v59, %v3081_v62  ;;  %v3346_v59 = vld [vmem:[%s4090_s15 + $0x60] sm:$0xff] }
 0x65c   : > { %v3338_v62 = vld [vmem:[%s4090_s15 + $0x20] sm:$0xff] }
 0x65d   : > { %v4421_v0 = vsub.f32 %v1892_v45, %v1913_v63  ;;  %v3097_v45 = vld [vmem:[%s4088_s12 + $0x28] sm:$0xf0] }
 0x65e   : > { %v3100_v46 = vor.u32 %v3322_v43, %v3097_v45 }
 0x65f   : > { %v1921_v35 = vmul.f32 %v4421_v0, %v4421_v0 }
 0x660   : > { %2126 = vmatpush.bf16.msra.mxu0 %v3100_v46 }
 0x661   : > { %1926 = vadd.xlane.f32.xlu0 %v1921_v35 }
 0x662   : > { %v1902_v18 = vpop.xlane.xlu0 %1901 }
 0x663   : > { %v1914_v40 = vmul.f32 %v4413_v17, %v1902_v18 }
 0x665   : > { %v4426_v42 = vsub.f32 %v1893_v50, %v1914_v40  ;;  %v3321_v50 = vld [vmem:[%s4088_s12 + $0x14] sm:$0xf0] }
 0x666   : > { %v3088_v53 = vor.u32 %v3321_v50, %v3087_v48 }
 0x667   : > { %v1922_v1 = vmul.f32 %v4426_v42, %v4426_v42 }
 0x668   : > { %2108 = vmatpush.bf16.msra.mxu3 %v3088_v53 }
 0x669   : > { %1928 = vadd.xlane.f32.xlu1 %v1922_v1 }
 0x66a   : > { %v1904_v2 = vpop.xlane.xlu1 %1903 }
 0x66b   : > { %v1915_v13 = vmul.f32 %v4413_v17, %v1904_v2 }
 0x66c   : > { %2109 = vmatpush.bf16.msra.mxu3 %v3080_v61  ;;  %v3345_v61 = vld [vmem:[%s4090_s15 + $0x58] sm:$0xff] }
 0x66d   : > { %v4431_v4 = vsub.f32 %v1894_v54, %v1915_v13  ;;  %v3089_v54 = vld [vmem:[%s4088_s12 + $0x18] sm:$0xf0] }
 0x66e   : > { %v3092_v56 = vor.u32 %v3320_v52, %v3089_v54 }
 0x66f   : > { %v1923_v24 = vmul.f32 %v4431_v4, %v4431_v4 }
 0x670   : > { %2127 = vmatpush.bf16.msra.mxu0 %v3092_v56  ;;  %v3349_v56 = vld [vmem:[%s4090_s15 + $0x78] sm:$0xff] }
 0x671   : > { %1930 = vadd.xlane.f32.xlu2 %v1923_v24  ;;  %2367 = vmatpush.bf16.msra.mxu2 %v3349_v56 }
 0x674   : > { %2128 = vmatpush.bf16.msra.mxu0 %v3084_v23  ;;  %v3344_v23 = vld [vmem:[%s4090_s15 + $0x50] sm:$0xff] }
 0x6cc   : > { %v1925_v55 = vpop.xlane.xlu2 %1924 }
 0x6cd   : > { %v1932_v14 = vmul.f32 %v1925_v55, %v4413_v17 }
 0x6cf   : > { %v1936_v60 = vadd.f32 1e-12, %v1932_v14  ;;  %v3348_v14 = vld [vmem:[%s4090_s15 + $0x70] sm:$0xff] }
 0x6d0   : > { %2368 = vmatpush.bf16.msra.mxu2 %v3348_v14 }
 0x6d1   : > { %3518 = vrsqrt.f32 %v1936_v60  ;;  %vm1946_vm2 = vweird.f32 %v1936_v60 }
 0x6d4   : > { %v1927_v63 = vpop.xlane.xlu0 %1926  ;;  %2369 = vmatpush.bf16.msra.mxu2 %v3347_v57 }
 0x6d5   : > { %v1933_v35 = vmul.f32 %v1927_v63, %v4413_v17  ;;  %v3337_v63 = vld [vmem:[%s4090_s15 + $0x18] sm:$0xff] }
 0x6d7   : > { %v3519_v18 = vpop.eup %3518  ;;  %v1937_v40 = vadd.f32 1e-12, %v1933_v35  ;;  %v2016_v35 = vld [vmem:[%s4136_s16] sm:$0x3] }
 0x6d8   : > { %v1941_v1 = vmul.f32 %v3519_v18, %v1936_v60  ;;  %vm1947_vm1 = vweird.f32 %v3519_v18  ;;  %2370 = vmatpush.bf16.msra.mxu2 %v3346_v59  ;;  %v3339_v60 = vld [vmem:[%s4090_s15 + $0x28] sm:$0xff] }
 0x6d9   : > { %3520 = vrsqrt.f32 %v1937_v40  ;;  %vm1948_vm3 = vmor %vm1946_vm2, %vm1947_vm1  ;;  %vm1956_vm5 = vweird.f32 %v1937_v40 }
 0x6da   : > { %v1942_v2 = vmul.f32 %v3519_v18, %v1941_v1  ;;  %v2019_v1 = vperm.slane %v2016_v35, 1 }
 0x6dc   : > { %v1943_v13 = vmul.f32 0.5, %v1942_v2  ;;  %v1929_v24 = vpop.xlane.xlu1 %1928  ;;  %2371 = vmatpush.bf16.msra.mxu2 %v3345_v61  ;;  %v3342_v2 = vld [vmem:[%s4090_s15 + $0x40] sm:$0xff] }
 0x6dd   : > { %v1934_v5 = vmul.f32 %v1929_v24, %v4413_v17  ;;  %v3335_v24 = vld [vmem:[%s4090_s15 + $0x8] sm:$0xff] }
 0x6de   : > { %v1944_v6 = vsub.f32 1.5, %v1943_v13 }
 0x6df   : > { %v3521_v7 = vpop.eup %3520  ;;  %v1938_v8 = vadd.f32 1e-12, %v1934_v5 }
 0x6e0   : > { %v1945_v9 = vmul.f32 %v3519_v18, %v1944_v6  ;;  %v1951_v30 = vmul.f32 %v3521_v7, %v1937_v40  ;;  %vm1957_vm4 = vweird.f32 %v3521_v7  ;;  %2372 = vmatpush.bf16.msra.mxu2 %v3344_v23  ;;  %v3336_v40 = vld [vmem:[%s4090_s15 + $0x10] sm:$0xff]  ;;  %v3334_v6 = vld [vmem:[%s4090_s15] sm:$0xff] }
 0x6e1   : > { %3522 = vrsqrt.f32 %v1938_v8  ;;  %vm1958_vm6 = vmor %vm1956_vm5, %vm1957_vm4  ;;  %vm1966_vm8 = vweird.f32 %v1938_v8 }
 0x6e2   : > { %v1952_v10 = vmul.f32 %v3521_v7, %v1951_v30  ;;  %v1949_v11 = vsel %vm1948_vm3, %v3519_v18, %v1945_v9  ;;  %v3343_v18 = vld [vmem:[%s4090_s15 + $0x48] sm:$0xff] }
 0x6e3   : > { %v1980_v21 = vmul.f32 %v1949_v11, %v4416_v22  ;;  %v3480_v22 = vld [vmem:[%s1000_s14] ss:$0 sm:$0xff] }
 0x6e4   : > { %v1953_v15 = vmul.f32 0.5, %v1952_v10  ;;  %v1931_v20 = vpop.xlane.xlu2 %1930  ;;  %2373 = vmatpush.bf16.msra.mxu2 %v3343_v18 }
 0x6e5   : > { %v1935_v16 = vmul.f32 %v1931_v20, %v4413_v17  ;;  %v1987_v3 = vmul.f32 %v3479_v12, %v1980_v21 }
 0x6e6   : > { %v1954_v19 = vsub.f32 1.5, %v1953_v15 }
 0x6e7   : > { %v3523_v47 = vpop.eup %3522  ;;  %v1939_v51 = vadd.f32 1e-12, %v1935_v16  ;;  %v4483_v34 = vadd.f32 %v3480_v22, %v1987_v3 }
 0x6e8   : > { %v1955_v25 = vmul.f32 %v3521_v7, %v1954_v19  ;;  %v1961_v27 = vmul.f32 %v3523_v47, %v1938_v8  ;;  %vm1967_vm7 = vweird.f32 %v3523_v47  ;;  %2374 = vmatpush.bf16.msra.mxu2 %v3342_v2  ;;  %v2018_v8 = vperm.slane %v2016_v35, 0 }
 0x6e9   : > { %3524 = vrsqrt.f32 %v1939_v51  ;;  %vm1968_vm9 = vmor %vm1966_vm8, %vm1967_vm7  ;;  %vm1976_vm11 = vweird.f32 %v1939_v51 }
 0x6ea   : > { %v1959_v28 = vsel %vm1958_vm6, %v3521_v7, %v1955_v25  ;;  %v1962_v29 = vmul.f32 %v3523_v47, %v1961_v27 }
 0x6eb   : > { %v1981_v31 = vmul.f32 %v1959_v28, %v4421_v0 }
 0x6ec   : > { %v1963_v26 = vmul.f32 0.5, %v1962_v29 }
 0x6ed   : > { %v1988_v32 = vmul.f32 %v3479_v12, %v1981_v31 }
 0x6ee   : > { %v1964_v49 = vsub.f32 1.5, %v1963_v26 }
 0x6ef   : > { %v3525_v33 = vpop.eup %3524  ;;  %v4485_v36 = vadd.f32 %v3480_v22, %v1988_v32 }
 0x6f0   : > { %v1965_v38 = vmul.f32 %v3523_v47, %v1964_v49  ;;  %v1971_v39 = vmul.f32 %v3525_v33, %v1939_v51  ;;  %vm1977_vm10 = vweird.f32 %v3525_v33 }
 0x6f1   : > { %v2014_v0 = vpack.c.bf16 %v4485_v36, %v4483_v34  ;;  %vm1978_vm12 = vmor %vm1976_vm11, %vm1977_vm10 }
 0x6f2   : > { %v1972_v41 = vmul.f32 %v3525_v33, %v1971_v39  ;;  %v1969_v43 = vsel %vm1968_vm9, %v3523_v47, %v1965_v38 }
 0x6f3   : > { %2110 = vmatmul.bf16.vlgmr.msra.gmra.mxu3 %v2014_v0  ;;  %2129 = vmatmul.bf16.vlgmr.msra.gmra.mxu0 %v2014_v0  ;;  %v1982_v45 = vmul.f32 %v1969_v43, %v4426_v42 }
 0x6f4   : > { %v1973_v37 = vmul.f32 0.5, %v1972_v41 }
 0x6f5   : > { %v1989_v52 = vmul.f32 %v3479_v12, %v1982_v45 }
 0x6f6   : > { %v1974_v44 = vsub.f32 1.5, %v1973_v37 }
 0x6f7   : > { %v4491_v54 = vadd.f32 %v3480_v22, %v1989_v52 }
 0x6f8   : > { %v1975_v46 = vmul.f32 %v3525_v33, %v1974_v44 }
 0x6fa   : > { %v1979_v48 = vsel %vm1978_vm12, %v3525_v33, %v1975_v46 }
 0x6fb   : > { %v1983_v50 = vmul.f32 %v1979_v48, %v4431_v4  ;;  %v3341_v4 = vld [vmem:[%s4090_s15 + $0x38] sm:$0xff] }
 0x6fc   : > { %2348 = vmatpush.bf16.msra.mxu1 %v3341_v4 }
 0x6fd   : > { %v1990_v53 = vmul.f32 %v3479_v12, %v1983_v50 }
 0x6ff   : > { %v4493_v55 = vadd.f32 %v3480_v22, %v1990_v53 }
 0x700   : > { %2349 = vmatpush.bf16.msra.mxu1 %v3340_v58 }
 0x701   : > { %v2015_v42 = vpack.c.bf16 %v4493_v55, %v4491_v54 }
 0x703   : > { %2115 = vmatmul.bf16.gmra.mxu3 %v2015_v42  ;;  %2134 = vmatmul.bf16.gmra.mxu0 %v2015_v42 }
 0x704   : > { %2350 = vmatpush.bf16.msra.mxu1 %v3339_v60 }
 0x708   : > { %2351 = vmatpush.bf16.msra.mxu1 %v3338_v62 }
 0x70c   : > { %2352 = vmatpush.bf16.msra.mxu1 %v3337_v63 }
 0x710   : > { %2353 = vmatpush.bf16.msra.mxu1 %v3336_v40 }
 0x714   : > { %2354 = vmatpush.bf16.msra.mxu1 %v3335_v24 }
 0x718   : > { %2355 = vmatpush.bf16.msra.mxu1 %v3334_v6 }
 0x770   : > { %v2130_v13 = vpop.f32.mrf.mxu0 }
 0x771   : > { %v2131_v5 = vadd.f32 %v2130_v13, %v2019_v1 }
 0x773   : > { %v2149_v7 = vmul.f32 0.044715, %v2131_v5  ;;  %v2141_v57 = vmul.f32 0.5, %v2131_v5 }
 0x775   : > { %v2157_v9 = vmul.f32 %v2149_v7, %v2131_v5 }
 0x776   : > { %v2111_v30 = vpop.f32.mrf.mxu3 }
 0x777   : > { %v2165_v10 = vmul.f32 %v2157_v9, %v2131_v5  ;;  %v2112_v11 = vadd.f32 %v2111_v30, %v2018_v8 }
 0x778   : > { %v2132_v15 = vpop.f32.mrf.mxu0 }
 0x779   : > { %v2173_v20 = vadd.f32 %v2165_v10, %v2131_v5  ;;  %v2148_v16 = vmul.f32 0.044715, %v2112_v11  ;;  %v2133_v19 = vadd.f32 %v2132_v15, %v2019_v1  ;;  %v2140_v5 = vmul.f32 0.5, %v2112_v11 }
 0x77b   : > { %v2156_v47 = vmul.f32 %v2148_v16, %v2112_v11  ;;  %v2151_v21 = vmul.f32 0.044715, %v2133_v19  ;;  %v2181_v51 = vmul.f32 0.7978846, %v2173_v20  ;;  %v2143_v58 = vmul.f32 0.5, %v2133_v19 }
 0x77d   : > { %v2164_v12 = vmul.f32 %v2156_v47, %v2112_v11  ;;  %v2159_v25 = vmul.f32 %v2151_v21, %v2133_v19  ;;  %3526 = vtanh.f32 %v2181_v51 }
 0x77e   : > { %v2113_v27 = vpop.f32.mrf.mxu3 }
 0x77f   : > { %v2172_v28 = vadd.f32 %v2164_v12, %v2112_v11  ;;  %v2167_v29 = vmul.f32 %v2159_v25, %v2133_v19  ;;  %v2114_v31 = vadd.f32 %v2113_v27, %v2018_v8 }
 0x780   : > { %v2135_v3 = vpop.f32.mrf.mxu0 }
 0x781   : > { %v2175_v22 = vadd.f32 %v2167_v29, %v2133_v19  ;;  %v2150_v26 = vmul.f32 0.044715, %v2114_v31  ;;  %v4514_v32 = vadd.f32 %v2135_v3, %v2019_v1  ;;  %v2180_v49 = vmul.f32 0.7978846, %v2172_v28 }
 0x782   : > { %v2142_v10 = vmul.f32 0.5, %v2114_v31 }
 0x783   : > { %v2183_v33 = vmul.f32 0.7978846, %v2175_v22  ;;  %v2158_v38 = vmul.f32 %v2150_v26, %v2114_v31  ;;  %v2153_v39 = vmul.f32 0.044715, %v4514_v32  ;;  %v3527_v43 = vpop.eup %3526  ;;  %v2145_v11 = vmul.f32 0.5, %v4514_v32 }
 0x784   : > { %v2197_v56 = vadd.f32 1.0, %v3527_v43 }
 0x785   : > { %v2166_v0 = vmul.f32 %v2158_v38, %v2114_v31  ;;  %3528 = vtanh.f32 %v2183_v33  ;;  %v2161_v41 = vmul.f32 %v2153_v39, %v4514_v32 }
 0x786   : > { %v2116_v37 = vpop.f32.mrf.mxu3  ;;  %3530 = vtanh.f32 %v2180_v49  ;;  %v2205_v35 = vmul.f32 %v2197_v56, %v2141_v57 }
 0x787   : > { %v2174_v44 = vadd.f32 %v2166_v0, %v2114_v31  ;;  %v2117_v45 = vadd.f32 %v2116_v37, %v2018_v8  ;;  %v2169_v46 = vmul.f32 %v2161_v41, %v4514_v32 }
 0x788   : > { %v2137_v48 = vpop.f32.mrf.mxu0 }
 0x789   : > { %v2182_v50 = vmul.f32 0.7978846, %v2174_v44  ;;  %v2152_v52 = vmul.f32 0.044715, %v2117_v45  ;;  %v2138_v53 = vadd.f32 %v2137_v48, %v2019_v1  ;;  %v2177_v42 = vadd.f32 %v2169_v46, %v4514_v32  ;;  %v3481_v32 = vld [vmem:[%s1007_s3] ss:$0 sm:$0xff] }
 0x78a   : > { %v2144_v0 = vmul.f32 0.5, %v2117_v45 }
 0x78b   : > { %v3529_v14 = vpop.eup %3528  ;;  %v2155_v4 = vmul.f32 0.044715, %v2138_v53  ;;  %3532 = vtanh.f32 %v2182_v50  ;;  %v2160_v60 = vmul.f32 %v2152_v52, %v2117_v45  ;;  %v2185_v23 = vmul.f32 0.7978846, %v2177_v42 }
 0x78c   : > { %v2199_v59 = vadd.f32 1.0, %v3529_v14  ;;  %v3531_v61 = vpop.eup %3530  ;;  %v2147_v31 = vmul.f32 0.5, %v2138_v53 }
 0x78d   : > { %v2163_v62 = vmul.f32 %v2155_v4, %v2138_v53  ;;  %v2168_v40 = vmul.f32 %v2160_v60, %v2117_v45  ;;  %v2196_v24 = vadd.f32 1.0, %v3531_v61  ;;  %3534 = vtanh.f32 %v2185_v23 }
 0x78e   : > { %v2118_v63 = vpop.f32.mrf.mxu3  ;;  %v2207_v18 = vmul.f32 %v2199_v59, %v2143_v58 }
 0x78f   : > { %v2119_v2 = vadd.f32 %v2118_v63, %v2018_v8  ;;  %v2171_v13 = vmul.f32 %v2163_v62, %v2138_v53  ;;  %v2176_v6 = vadd.f32 %v2168_v40, %v2117_v45  ;;  %v2204_v47 = vmul.f32 %v2196_v24, %v2140_v5 }
 0x790   : > { %v2245_v1 = vpack.c.bf16 %v2207_v18, %v2205_v35 }
 0x791   : > { %v3533_v7 = vpop.eup %3532  ;;  %v2154_v9 = vmul.f32 0.044715, %v2119_v2  ;;  %v2179_v30 = vadd.f32 %v2171_v13, %v2138_v53  ;;  %v2184_v19 = vmul.f32 0.7978846, %v2176_v6  ;;  %v2146_v41 = vmul.f32 0.5, %v2119_v2 }
 0x792   : > { %2375 = vmatmul.bf16.vlgmr.msra.gmra.mxu2 %v2245_v1  ;;  %v2198_v15 = vadd.f32 1.0, %v3533_v7 }
 0x793   : > { %v2187_v20 = vmul.f32 0.7978846, %v2179_v30  ;;  %v2162_v16 = vmul.f32 %v2154_v9, %v2119_v2  ;;  %v3535_v12 = vpop.eup %3534 }
 0x794   : > { %v2206_v21 = vmul.f32 %v2198_v15, %v2142_v10  ;;  %v2201_v28 = vadd.f32 1.0, %v3535_v12 }
 0x795   : > { %3536 = vtanh.f32 %v2187_v20  ;;  %v2170_v51 = vmul.f32 %v2162_v16, %v2119_v2 }
 0x796   : > { %v2244_v8 = vpack.c.bf16 %v2206_v21, %v2204_v47  ;;  %3538 = vtanh.f32 %v2184_v19  ;;  %v2209_v26 = vmul.f32 %v2201_v28, %v2145_v11 }
 0x797   : > { %v2178_v25 = vadd.f32 %v2170_v51, %v2119_v2 }
 0x798   : > { %2356 = vmatmul.bf16.vlgmr.msra.gmra.mxu1 %v2244_v8 }
 0x799   : > { %v2186_v27 = vmul.f32 0.7978846, %v2178_v25 }
 0x79b   : > { %v3537_v29 = vpop.eup %3536  ;;  %3540 = vtanh.f32 %v2186_v27 }
 0x79c   : > { %v2203_v3 = vadd.f32 1.0, %v3537_v29  ;;  %v3539_v22 = vpop.eup %3538 }
 0x79d   : > { %v2200_v38 = vadd.f32 1.0, %v3539_v22 }
 0x79e   : > { %v2211_v49 = vmul.f32 %v2203_v3, %v2147_v31 }
 0x79f   : > { %v2208_v43 = vmul.f32 %v2200_v38, %v2144_v0  ;;  %v3483_v0 = vld [vmem:[%s1013_s7] ss:$0 sm:$0xff]  ;;  %s4692_s7 = sld [smem:[#allocation24_spill]] (!%p3205_p1) }
 0x7a0   : > { %v2247_v33 = vpack.c.bf16 %v2211_v49, %v2209_v26 }
 0x7a1   : > { %v3541_v39 = vpop.eup %3540 }
 0x7a2   : > { %2380 = vmatmul.bf16.gmra.mxu2 %v2247_v33  ;;  %v2202_v37 = vadd.f32 1.0, %v3541_v39  ;;  %v3482_v33 = vld [vmem:[%s1010_s22] ss:$0 sm:$0xff] }
 0x7a4   : > { %v2210_v44 = vmul.f32 %v2202_v37, %v2146_v41 }
 0x7a6   : > { %v2246_v46 = vpack.c.bf16 %v2210_v44, %v2208_v43 }
 0x7a8   : > { %2361 = vmatmul.bf16.gmra.mxu1 %v2246_v46 }
 0x815   : > { %v2357_v48 = vpop.f32.mrf.mxu1  ;;  %v2376_v50 = vpop.f32.mrf.mxu2 }
 0x816   : > { %v2358_v52 = vadd.f32 %v3481_v32, %v2357_v48 }
 0x818   : > { %v2377_v53 = vadd.f32 %v2376_v50, %v2358_v52 }
 0x81a   : > { %v2386_v42 = vadd.f32 %v2377_v53, %v4483_v34 }
 0x81c   : > { %2392 = vadd.xlane.f32.xlu0 %v2386_v42 }
 0x81d   : > { %v2359_v56 = vpop.f32.mrf.mxu1  ;;  %v2378_v45 = vpop.f32.mrf.mxu2 }
 0x81e   : > { %v2360_v14 = vadd.f32 %v3481_v32, %v2359_v56 }
 0x820   : > { %v2379_v4 = vadd.f32 %v2378_v45, %v2360_v14 }
 0x822   : > { %v2387_v57 = vadd.f32 %v2379_v4, %v4485_v36 }
 0x824   : > { %2394 = vadd.xlane.f32.xlu1 %v2387_v57 }
 0x825   : > { %v2362_v58 = vpop.f32.mrf.mxu1  ;;  %v2381_v59 = vpop.f32.mrf.mxu2 }
 0x826   : > { %v2363_v60 = vadd.f32 %v3481_v32, %v2362_v58 }
 0x828   : > { %v2382_v61 = vadd.f32 %v2381_v59, %v2363_v60 }
 0x82a   : > { %v2388_v62 = vadd.f32 %v2382_v61, %v4491_v54 }
 0x82c   : > { %2396 = vadd.xlane.f32.xlu2 %v2388_v62 }
 0x82d   : > { %v2364_v23 = vpop.f32.mrf.mxu1  ;;  %v2383_v35 = vpop.f32.mrf.mxu2 }
 0x82e   : > { %v2365_v63 = vadd.f32 %v3481_v32, %v2364_v23 }
 0x830   : > { %v2384_v18 = vadd.f32 %v2383_v35, %v2365_v63 }
 0x832   : > { %v2389_v34 = vadd.f32 %v2384_v18, %v4493_v55 }
 0x834   : > { %2398 = vadd.xlane.f32.xlu0 %v2389_v34 }
 0x88f   : > { %v2393_v40 = vpop.xlane.xlu0 %2392 }
 0x890   : > { %v2400_v2 = vmul.f32 %v2393_v40, %v4413_v17 }
 0x892   : > { %v2404_v13 = vsub.f32 %v2386_v42, %v2400_v2 }
 0x894   : > { %v2408_v36 = vmul.f32 %v2404_v13, %v2404_v13 }
 0x896   : > { %2412 = vadd.xlane.f32.xlu1 %v2408_v36 }
 0x897   : > { %v2395_v1 = vpop.xlane.xlu1 %2394 }
 0x898   : > { %v2401_v24 = vmul.f32 %v2395_v1, %v4413_v17 }
 0x89a   : > { %v2405_v6 = vsub.f32 %v2387_v57, %v2401_v24 }
 0x89c   : > { %v2409_v7 = vmul.f32 %v2405_v6, %v2405_v6 }
 0x89e   : > { %2414 = vadd.xlane.f32.xlu2 %v2409_v7 }
 0x89f   : > { %v2397_v54 = vpop.xlane.xlu2 %2396 }
 0x8a0   : > { %v2402_v9 = vmul.f32 %v2397_v54, %v4413_v17 }
 0x8a2   : > { %v4533_v30 = vsub.f32 %v2388_v62, %v2402_v9 }
 0x8a4   : > { %v2410_v55 = vmul.f32 %v4533_v30, %v4533_v30 }
 0x8a6   : > { %2416 = vadd.xlane.f32.xlu0 %v2410_v55 }
 0x8a7   : > { %v2399_v5 = vpop.xlane.xlu0 %2398 }
 0x8a8   : > { %v2403_v10 = vmul.f32 %v2399_v5, %v4413_v17 }
 0x8aa   : > { %v4538_v15 = vsub.f32 %v2389_v34, %v2403_v10 }
 0x8ac   : > { %v2411_v20 = vmul.f32 %v4538_v15, %v4538_v15 }
 0x8ae   : > { %2418 = vadd.xlane.f32.xlu1 %v2411_v20 }
 0x909   : > { %v2413_v16 = vpop.xlane.xlu1 %2412 }
 0x90a   : > { %v2420_v19 = vmul.f32 %v2413_v16, %v4413_v17 }
 0x90c   : > { %v2424_v47 = vadd.f32 1e-12, %v2420_v19 }
 0x90e   : > { %3542 = vrsqrt.f32 %v2424_v47  ;;  %vm2434_vm15 = vweird.f32 %v2424_v47 }
 0x911   : > { %v2415_v21 = vpop.xlane.xlu2 %2414 }
 0x912   : > { %v2421_v51 = vmul.f32 %v2415_v21, %v4413_v17 }
 0x914   : > { %v3543_v8 = vpop.eup %3542  ;;  %v2425_v12 = vadd.f32 1e-12, %v2421_v51 }
 0x915   : > { %v2429_v25 = vmul.f32 %v3543_v8, %v2424_v47  ;;  %vm2435_vm14 = vweird.f32 %v3543_v8 }
 0x916   : > { %3544 = vrsqrt.f32 %v2425_v12  ;;  %vm2436_vm0 = vmor %vm2434_vm15, %vm2435_vm14  ;;  %vm2444_vm2 = vweird.f32 %v2425_v12 }
 0x917   : > { %v2430_v27 = vmul.f32 %v3543_v8, %v2429_v25 }
 0x919   : > { %v2431_v28 = vmul.f32 0.5, %v2430_v27  ;;  %v2417_v29 = vpop.xlane.xlu0 %2416 }
 0x91a   : > { %v2422_v11 = vmul.f32 %v2417_v29, %v4413_v17 }
 0x91b   : > { %v2432_v31 = vsub.f32 1.5, %v2431_v28 }
 0x91c   : > { %v3545_v3 = vpop.eup %3544  ;;  %v2426_v22 = vadd.f32 1e-12, %v2422_v11 }
 0x91d   : > { %v2433_v26 = vmul.f32 %v3543_v8, %v2432_v31  ;;  %v2439_v49 = vmul.f32 %v3545_v3, %v2425_v12  ;;  %vm2445_vm1 = vweird.f32 %v3545_v3 }
 0x91e   : > { %3546 = vrsqrt.f32 %v2426_v22  ;;  %vm2446_vm3 = vmor %vm2444_vm2, %vm2445_vm1  ;;  %vm2454_vm5 = vweird.f32 %v2426_v22 }
 0x91f   : > { %v2437_v38 = vsel %vm2436_vm0, %v3543_v8, %v2433_v26  ;;  %v2440_v39 = vmul.f32 %v3545_v3, %v2439_v49 }
 0x920   : > { %v2468_v41 = vmul.f32 %v2437_v38, %v2404_v13 }
 0x921   : > { %v2441_v37 = vmul.f32 0.5, %v2440_v39  ;;  %v2419_v43 = vpop.xlane.xlu1 %2418 }
 0x922   : > { %v2475_v44 = vmul.f32 %v3482_v33, %v2468_v41  ;;  %v2423_v46 = vmul.f32 %v2419_v43, %v4413_v17 }
 0x923   : > { %v2442_v32 = vsub.f32 1.5, %v2441_v37 }
 0x924   : > { %v3547_v48 = vpop.eup %3546  ;;  %v2482_v50 = vadd.f32 %v3483_v0, %v2475_v44  ;;  %v2427_v52 = vadd.f32 1e-12, %v2423_v46 }
 0x925   : > { %v2443_v53 = vmul.f32 %v3545_v3, %v2442_v32  ;;  %v2449_v42 = vmul.f32 %v3547_v48, %v2426_v22  ;;  %vm2455_vm4 = vweird.f32 %v3547_v48 }
 0x926   : > { %2486 = vst [vmem:[#allocation2 + $0x10] sm:$0xff] %v2482_v50  ;;  %3548 = vrsqrt.f32 %v2427_v52  ;;  %vm2456_vm6 = vmor %vm2454_vm5, %vm2455_vm4  ;;  %vm2464_vm8 = vweird.f32 %v2427_v52 }
 0x927   : > { %v2447_v56 = vsel %vm2446_vm3, %v3545_v3, %v2443_v53  ;;  %v2450_v45 = vmul.f32 %v3547_v48, %v2449_v42 }
 0x928   : > { %v2469_v14 = vmul.f32 %v2447_v56, %v2405_v6 }
 0x929   : > { %v2451_v4 = vmul.f32 0.5, %v2450_v45 }
 0x92a   : > { %v2476_v57 = vmul.f32 %v3482_v33, %v2469_v14 }
 0x92b   : > { %v2452_v58 = vsub.f32 1.5, %v2451_v4 }
 0x92c   : > { %v3549_v59 = vpop.eup %3548  ;;  %v2483_v17 = vadd.f32 %v3483_v0, %v2476_v57 }
 0x92d   : > { %v2453_v60 = vmul.f32 %v3547_v48, %v2452_v58  ;;  %v2459_v61 = vmul.f32 %v3549_v59, %v2427_v52  ;;  %vm2465_vm7 = vweird.f32 %v3549_v59 }
 0x92e   : > { %2487 = vst [vmem:[#allocation2] sm:$0xff] %v2483_v17  ;;  %vm2466_vm9 = vmor %vm2464_vm8, %vm2465_vm7 }
 0x92f   : > { %v2457_v62 = vsel %vm2456_vm6, %v3547_v48, %v2453_v60  ;;  %v2460_v23 = vmul.f32 %v3549_v59, %v2459_v61 }
 0x930   : > { %v2470_v63 = vmul.f32 %v2457_v62, %v4533_v30 }
 0x931   : > { %v2461_v35 = vmul.f32 0.5, %v2460_v23 }
 0x932   : > { %v2477_v18 = vmul.f32 %v3482_v33, %v2470_v63 }
 0x933   : > { %v2462_v34 = vsub.f32 1.5, %v2461_v35 }
 0x934   : > { %v2484_v40 = vadd.f32 %v3483_v0, %v2477_v18 }
 0x935   : > { %v2463_v2 = vmul.f32 %v3549_v59, %v2462_v34 }
 0x936   : > { %2488 = vst [vmem:[#allocation2 + $0x18] sm:$0xff] %v2484_v40 }
 0x937   : > { %v2467_v13 = vsel %vm2466_vm9, %v3549_v59, %v2463_v2 }
 0x938   : > { %v2471_v36 = vmul.f32 %v2467_v13, %v4538_v15 }
 0x93a   : > { %v2478_v1 = vmul.f32 %v3482_v33, %v2471_v36  ;;  %2493 = sbr.rel (%p3205_p1) target bundleno = 2781 (0xadd), region = 148 }
 0x93c   : > { %v2485_v24 = vadd.f32 %v3483_v0, %v2478_v1 }
 0x93e   : > { %2489 = vst [vmem:[#allocation2 + $0x8] sm:$0xff] %v2485_v24 }
 0x93f   : > { %v2496_v6 = vpack.c.bf16 %v2485_v24, %v2484_v40  ;;  %v3357_v7 = vld [vmem:[#allocation10 + $0x38] sm:$0xff]  ;;  %v2495_v54 = vpack.c.bf16 %v2483_v17, %v2482_v50  ;;  %v3356_v9 = vld [vmem:[#allocation10 + $0x30] sm:$0xff]  ;;  %v2494_v30 = vld [vmem:[%s4692_s7] sm:$0xf] }
 0x940   : > { %2582 = vmatpush.bf16.msra.mxu1 %v3357_v7  ;;  %v3355_v55 = vld [vmem:[#allocation10 + $0x28] sm:$0xff]  ;;  %v3354_v5 = vld [vmem:[#allocation10 + $0x20] sm:$0xff]  ;;  %v3353_v10 = vld [vmem:[#allocation10 + $0x18] sm:$0xff] }
 0x941   : > { %2506 = vmatpush.bf16.msra.mxu0 %v2496_v6  ;;  %v3352_v15 = vld [vmem:[#allocation10 + $0x10] sm:$0xff]  ;;  %v3351_v20 = vld [vmem:[#allocation10 + $0x8] sm:$0xff]  ;;  %v3350_v16 = vld [vmem:[#allocation10] sm:$0xff] }
 0x942   : > { %v3365_v19 = vld [vmem:[#allocation11 + $0x38] sm:$0xff]  ;;  %v3364_v47 = vld [vmem:[#allocation11 + $0x30] sm:$0xff]  ;;  %v3363_v21 = vld [vmem:[#allocation11 + $0x28] sm:$0xff] }
 0x943   : > { %2665 = vmatpush.bf16.msra.mxu2 %v3365_v19  ;;  %v3362_v51 = vld [vmem:[#allocation11 + $0x20] sm:$0xff]  ;;  %v3361_v8 = vld [vmem:[#allocation11 + $0x18] sm:$0xff]  ;;  %v3360_v28 = vld [vmem:[#allocation11 + $0x10] sm:$0xff] }
 0x944   : > { %2583 = vmatpush.bf16.msra.mxu1 %v3356_v9  ;;  %v3359_v29 = vld [vmem:[#allocation11 + $0x8] sm:$0xff]  ;;  %v3358_v11 = vld [vmem:[#allocation11] sm:$0xff] }
 0x945   : > { %2507 = vmatpush.bf16.msra.mxu0 %v2495_v54  ;;  %v3550_v31 = vld [vmem:[%s4693_s10] ss:$0 sm:$0xff] }
 0x946   : > { %v3551_v38 = vld [vmem:[%s4694_s19] ss:$0 sm:$0xff] }
 0x947   : > { %2666 = vmatpush.bf16.msra.mxu2 %v3364_v47 }
 0x948   : > { %3206 = vmatmul.msk.bf16.vlgmr.msra.gmra.mxu0 %vm1509_vm13, %v2494_v30  ;;  %2584 = vmatpush.bf16.msra.mxu1 %v3355_v55 }
 0x94b   : > { %2667 = vmatpush.bf16.msra.mxu2 %v3363_v21 }
 0x94c   : > { %2585 = vmatpush.bf16.msra.mxu1 %v3354_v5 }
 0x94f   : > { %2668 = vmatpush.bf16.msra.mxu2 %v3362_v51 }
 0x950   : > { %2586 = vmatpush.bf16.msra.mxu1 %v3353_v10 }
 0x953   : > { %2669 = vmatpush.bf16.msra.mxu2 %v3361_v8 }
 0x954   : > { %2587 = vmatpush.bf16.msra.mxu1 %v3352_v15 }
 0x957   : > { %2670 = vmatpush.bf16.msra.mxu2 %v3360_v28 }
 0x958   : > { %2588 = vmatpush.bf16.msra.mxu1 %v3351_v20 }
 0x95b   : > { %2671 = vmatpush.bf16.msra.mxu2 %v3359_v29 }
 0x95c   : > { %2589 = vmatpush.bf16.msra.mxu1 %v3350_v16 }
 0x95f   : > { %2672 = vmatpush.bf16.msra.mxu2 %v3358_v11 }
 0x9c5   : > { %v2509_v12 = vpop.f32.mrf.mxu0 }
 0x9c6   : > { %v2529_v25 = vpack.c.bf16 %v2509_v12, %v2509_v12 }
 0x9c8   : > { %2590 = vmatmul.bf16.vlgmr.msra.gmra.mxu1 %v2529_v25 }
 0x9cd   : > { %v2511_v27 = vpop.f32.mrf.mxu0 }
 0xa45   : > { %v2591_v3 = vpop.f32.mrf.mxu1 }
 0xa46   : > { %v2592_v22 = vadd.f32 %v3550_v31, %v2591_v3 }
 0xa48   : > { %3552 = vtanh.f32 %v2592_v22 }
 0xa4d   : > { %v2593_v26 = vpop.f32.mrf.mxu1 }
 0xa4e   : > { %v3553_v49 = vpop.eup %3552 }
 0xa4f   : > { %v2612_v33 = vpack.c.bf16 %v3553_v49, %v3553_v49 }
 0xa51   : > { %2673 = vmatmul.bf16.vlgmr.msra.gmra.mxu2 %v2612_v33 }
 0xad4   : > { %v2674_v39 = vpop.f32.mrf.mxu2 }
 0xad5   : > { %v2675_v0 = vadd.f32 %v3551_v38, %v2674_v39 }
 0xad7   : > { %2678 = vst [vmem:[%s4695_s29] sm:$0xff] %v2675_v0 }
 0xadc   : > { %v2676_v41 = vpop.f32.mrf.mxu2 }
 0xadd PF: > { %s4696_s28 = sld [smem:[#allocation18_spill]]  ;;  %s4698_s5 = smov %s3776_s26 }
 0xade   : > { %s4697_s23 = sld [smem:[#allocation19_spill]]  ;;  %s4699_s26 = smov %s3780_s27 }
 0xae3   : > { %p39_p4 = scmp.ge.s32.totalorder %s4696_s28, 4  }
 0xae4   : > { %s4700_s27 = smov %s4697_s23 }
 0xae5   :  { %41 = sbr.rel (!%p39_p4) target bundleno = 32 (0x20), region = 224 }
 0xaea   :  { %2690 = vsyncpa [#allocation4], 1 }
 0xaeb   :  { %2692 = vsyncpa [#allocation4 + $0x1], 1 }
 0xaec   :  { %2693 = vsyncpa [#allocation6], 1 }
 0xaed   :  { %2695 = vsyncpa [#allocation6 + $0x1], 1 }
 0xaee   :  { %2696 = vsyncpa [#allocation9], 1 }
 0xaef   :  { %2698 = vsyncpa [#allocation9 + $0x1], 1 }
 0xaf0   :  { %2699 = vsyncpa [#allocation12], 1 }

</bundles_post_ra>
